<compile_context>
chip_gen: v5e
topology: v5e:2x2
jax: 0.10.0
libtpu: 0.0.40
codegen_flags: <defaults>
</compile_context>

<pallas_src>
import functools

import jax
import jax.numpy as jnp
from jax.experimental import pallas as pl
from jax.experimental.pallas import tpu as pltpu


def _conv_mm_kernel(p_ref, w_ref, b_ref, *rest, has_res):
    # p_ref : (9*Cin, TILE_H*W)  channel-major im2col patches, bf16
    # w_ref : (Cout, 9*Cin)      weight slab, bf16 (constant index_map -> resident)
    # b_ref : (Cout, 1)          bias, f32
    # rest  : [res_ref,] o_ref   lane-dense (Cout, TILE_H*W) residual / output
    if has_res:
        res_ref, o_ref = rest
    else:
        (o_ref,) = rest

    # One MXU matmul per grid step; result is already lane-dense (spatial on lanes).
    acc = jnp.dot(w_ref[...], p_ref[...], preferred_element_type=jnp.float32)
    acc = acc + b_ref[...]                        # bias broadcast along lanes (f32)
    if has_res:
        acc = acc + res_ref[...].astype(jnp.float32)   # fused residual add (f32)
    o_ref[...] = acc.astype(o_ref.dtype)          # single unmasked wide store


def _pick_tile_h(h, w, cap=16):
    # Largest row tile that keeps the lane dim (tile_h * w) 128-aligned.
    for t in (32, 16, 8):
        if t <= cap and h % t == 0 and (t * w) % 128 == 0:
            return t
    return h  # fall back to a single full-height tile (block == full dim is legal)


def conv3x3_bias(x_nchw, w_oihw, bias, *, residual=None, relu_input=False,
                 out_dtype=jnp.bfloat16, tile_h_cap=16):
    """[relu ->] 3x3 / stride 1 / pad 1 conv + bias [+ residual].

    x_nchw   : (N, Cin, H, W)       activation (any float dtype; cast to bf16)
    residual : (N, Cout, H*W) bf16  lane-dense, added in f32 inside the kernel
    returns  : (N, Cout, H*W)       out_dtype, lane-dense channel-major
    """
    n, cin, h, w = x_nchw.shape
    cout, cin_w, kh_n, kw_n = w_oihw.shape
    assert (cin_w, kh_n, kw_n) == (cin, 3, 3)

    x = x_nchw
    if relu_input:
        # ReLU in the wrapper: XLA fuses it into the im2col producer below, so it
        # runs once per element (not once per duplicated tap) and keeps bf16
        # elementwise off the kernel's VPU path (v5e has no bf16 VALU).
        x = jnp.maximum(x, 0)

    # Channel-major im2col: pad H/W by 1 and stack the 9 taps along channels.
    # One fused XLA producer (pad + slices + concat + cast); turns the conv into
    # a single big matmul with contraction K = 9*Cin.
    xp = jnp.pad(x, ((0, 0), (0, 0), (1, 1), (1, 1)))
    patches = jnp.concatenate(
        [xp[:, :, i:i + h, j:j + w] for i in range(3) for j in range(3)], axis=1)
    patches = patches.reshape(n, 9 * cin, h * w).astype(jnp.bfloat16)

    k = 9 * cin
    # OIHW -> (Cout, Kh, Kw, Cin) -> (Cout, 9*Cin), matching the patch tap order.
    w2 = jnp.transpose(w_oihw, (0, 2, 3, 1)).reshape(cout, k).astype(jnp.bfloat16)
    b2 = bias.reshape(cout, 1).astype(jnp.float32)

    tile_h = _pick_tile_h(h, w, tile_h_cap)
    tw = tile_h * w
    has_res = residual is not None
    kernel = functools.partial(_conv_mm_kernel, has_res=has_res)

    in_specs = [
        # (9*Cin, TILE_H*W) patch slab per step
        pl.BlockSpec((None, k, tw), lambda b, t: (b, 0, t)),
        # weights / bias: constant index_map -> fetched once, stay resident in VMEM
        pl.BlockSpec((cout, k), lambda b, t: (0, 0)),
        pl.BlockSpec((cout, 1), lambda b, t: (0, 0)),
    ]
    args = [patches, w2, b2]
    if has_res:
        in_specs.append(pl.BlockSpec((None, cout, tw), lambda b, t: (b, 0, t)))
        args.append(residual)

    return pl.pallas_call(
        kernel,
        out_shape=jax.ShapeDtypeStruct((n, cout, h * w), out_dtype),
        grid=(n, h // tile_h),
        in_specs=in_specs,
        out_specs=pl.BlockSpec((None, cout, tw), lambda b, t: (b, 0, t)),
        compiler_params=pltpu.CompilerParams(
            dimension_semantics=("parallel", "parallel")),
    )(*args)


def bilinear_upsample_nchw(x, scale):
    """F.interpolate(x, scale_factor=scale, mode='bilinear', align_corners=False)."""
    # TODO(synk): kept in plain XLA (gather + lerp); no matmul content to offload.
    n, c, h, w = x.shape

    def src(in_size):
        o = jnp.arange(in_size * scale, dtype=jnp.float32)
        s = jnp.maximum((o + 0.5) / scale - 0.5, 0.0)
        i0 = jnp.minimum(jnp.floor(s).astype(jnp.int32), in_size - 1)
        i1 = jnp.minimum(i0 + 1, in_size - 1)
        return i0, i1, s - i0.astype(jnp.float32)

    h0, h1, fh = src(h)
    w0, w1, fw = src(w)
    rows = (x[:, :, h0, :] * (1.0 - fh)[None, None, :, None]
            + x[:, :, h1, :] * fh[None, None, :, None])
    return (rows[:, :, :, w0] * (1.0 - fw)[None, None, None, :]
            + rows[:, :, :, w1] * fw[None, None, None, :])


def upsample_block_forward(skip_f, up_f, params, scale_factor=2):
    """NCHW in / NCHW out; same semantics as UpsampleBlock.forward."""
    n, _, h, w = skip_f.shape
    up_c = params["skip_w"].shape[0]
    out_c = params["c1_w"].shape[0]

    # Upsampled feature as a lane-dense bf16 residual for the skip conv.
    up2 = bilinear_upsample_nchw(up_f, scale_factor)               # (N, up_c, H, W) f32
    up2_ld = up2.reshape(n, up_c, h * w).astype(jnp.bfloat16)

    # x = skip_conv(skip_f) + upsample(up_f)   (residual add fused into the conv)
    x_ld = conv3x3_bias(skip_f, params["skip_w"], params["skip_b"], residual=up2_ld)
    x = x_ld.reshape(n, up_c, h, w)                                # free metadata reshape

    # ResBlock: r = conv2(relu(conv1(relu(x))));  out = downsample(x) + r
    r1 = conv3x3_bias(x, params["c1_w"], params["c1_b"], relu_input=True)
    r1 = r1.reshape(n, out_c, h, w)

    if "ds_w" in params:                                           # up_c != out_c
        r_ld = conv3x3_bias(r1, params["c2_w"], params["c2_b"], relu_input=True)
        out_ld = conv3x3_bias(x, params["ds_w"], params["ds_b"],
                              residual=r_ld, out_dtype=jnp.float32)
    else:                                                          # identity skip fused
        out_ld = conv3x3_bias(r1, params["c2_w"], params["c2_b"], relu_input=True,
                              residual=x_ld, out_dtype=jnp.float32)
    return out_ld.reshape(n, out_c, h, w)                          # already NCHW


def reference_forward(skip_f, up_f, params, scale_factor=2):
    """XLA reference with the same bf16-in / f32-accumulate conv quantization."""
    def conv(x, wgt, b):
        y = jax.lax.conv_general_dilated(
            x.astype(jnp.bfloat16), wgt.astype(jnp.bfloat16),
            window_strides=(1, 1), padding=[(1, 1), (1, 1)],
            dimension_numbers=("NCHW", "OIHW", "NCHW"),
            preferred_element_type=jnp.float32)
        return y + b[None, :, None, None]

    x = conv(skip_f, params["skip_w"], params["skip_b"])
    x = x + bilinear_upsample_nchw(up_f, scale_factor)
    r = conv(jnp.maximum(x, 0.0), params["c1_w"], params["c1_b"])
    r = conv(jnp.maximum(r, 0.0), params["c2_w"], params["c2_b"])
    if "ds_w" in params:
        x = conv(x, params["ds_w"], params["ds_b"])
    return x + r


if __name__ == "__main__":
    key = jax.random.PRNGKey(0)
    k = jax.random.split(key, 10)

    N = 2
    SKIP_C, UP_C, OUT_C = 4, 8, 16          # up_c != out_c -> ResBlock has downsample
    H_UP, W_UP = 16, 16                     # up_f spatial; skip_f is 2x that
    SCALE = 2
    H, W = H_UP * SCALE, W_UP * SCALE

    skip_f = jax.random.normal(k[0], (N, SKIP_C, H, W), jnp.float32)
    up_f = jax.random.normal(k[1], (N, UP_C, H_UP, W_UP), jnp.float32)

    def conv_init(kw_, kb_, cin, cout):
        return (0.1 * jax.random.normal(kw_, (cout, cin, 3, 3), jnp.float32),
                0.1 * jax.random.normal(kb_, (cout,), jnp.float32))

    params = {}
    params["skip_w"], params["skip_b"] = conv_init(k[2], k[3], SKIP_C, UP_C)
    params["c1_w"], params["c1_b"] = conv_init(k[4], k[5], UP_C, OUT_C)
    params["c2_w"], params["c2_b"] = conv_init(k[6], k[7], OUT_C, OUT_C)
    params["ds_w"], params["ds_b"] = conv_init(k[8], k[9], UP_C, OUT_C)

    fwd = jax.jit(functools.partial(upsample_block_forward, scale_factor=SCALE))
    out = jax.block_until_ready(fwd(skip_f, up_f, params))

    ref = jax.block_until_ready(reference_forward(skip_f, up_f, params, SCALE))

    assert out.shape == (N, OUT_C, H, W), (out.shape, (N, OUT_C, H, W))
    max_err = float(jnp.max(jnp.abs(out - ref)))
    assert jnp.allclose(out, ref, rtol=3e-2, atol=3e-2), max_err

    print("KERNEL_OK")
</pallas_src>

<mosaic_0001>
module attributes {stable_mosaic.version = 11 : i64} {
  func.func @_conv_mm_kernel(%arg0: i32, %arg1: i32, %arg2: memref<1x36x512xbf16, #tpu.memory_space<vmem>>, %arg3: memref<8x36xbf16, #tpu.memory_space<vmem>>, %arg4: memref<8x1xf32, #tpu.memory_space<vmem>>, %arg5: memref<1x8x512xbf16, #tpu.memory_space<vmem>>, %arg6: memref<1x8x512xbf16, #tpu.memory_space<vmem>>) attributes {dimension_semantics = [#tpu.dimension_semantics<parallel>, #tpu.dimension_semantics<parallel>], iteration_bounds = array<i64: 2, 2>, scalar_prefetch = 0 : i64, scratch_operands = 0 : i64, tpu.core_type = #tpu.core_type<tc>, window_params = [{transform_indices = @transform_0, window_bounds = array<i64: 1, 36, 512>}, {pipeline_mode = #tpu.pipeline_mode<synchronous>, transform_indices = @transform_1, window_bounds = array<i64: 8, 36>}, {pipeline_mode = #tpu.pipeline_mode<synchronous>, transform_indices = @transform_2, window_bounds = array<i64: 8, 1>}, {transform_indices = @transform_3, window_bounds = array<i64: 1, 8, 512>}, {transform_indices = @transform_4, window_bounds = array<i64: 1, 8, 512>}]} {
    %c0 = arith.constant 0 : index
    %c0_0 = arith.constant 0 : index
    %0 = vector.load %arg3[%c0, %c0_0] : memref<8x36xbf16, #tpu.memory_space<vmem>>, vector<8x36xbf16>
    %c0_1 = arith.constant 0 : index
    %c0_2 = arith.constant 0 : index
    %c0_3 = arith.constant 0 : index
    %1 = vector.load %arg2[%c0_1, %c0_2, %c0_3] : memref<1x36x512xbf16, #tpu.memory_space<vmem>>, vector<1x36x512xbf16>
    %2 = vector.shape_cast %1 : vector<1x36x512xbf16> to vector<36x512xbf16>
    %cst = arith.constant dense<0.000000e+00> : vector<8x512xf32>
    %3 = tpu.matmul %0, %2, %cst {dimension_numbers = #tpu.dot_dimension_numbers<[1], [0], [0], [1], [0, 0, 1, 1], [], []>} : vector<8x36xbf16>, vector<36x512xbf16>, vector<8x512xf32> -> vector<8x512xf32>
    %c0_4 = arith.constant 0 : index
    %c0_5 = arith.constant 0 : index
    %4 = vector.load %arg4[%c0_4, %c0_5] : memref<8x1xf32, #tpu.memory_space<vmem>>, vector<8x1xf32>
    %5 = vector.broadcast %4 : vector<8x1xf32> to vector<8x512xf32>
    %6 = arith.addf %3, %5 : vector<8x512xf32>
    %c0_6 = arith.constant 0 : index
    %c0_7 = arith.constant 0 : index
    %c0_8 = arith.constant 0 : index
    %7 = vector.load %arg5[%c0_6, %c0_7, %c0_8] : memref<1x8x512xbf16, #tpu.memory_space<vmem>>, vector<1x8x512xbf16>
    %8 = vector.shape_cast %7 : vector<1x8x512xbf16> to vector<8x512xbf16>
    %9 = arith.extf %8 : vector<8x512xbf16> to vector<8x512xf32>
    %10 = arith.addf %6, %9 : vector<8x512xf32>
    %11 = arith.truncf %10 : vector<8x512xf32> to vector<8x512xbf16>
    %c0_9 = arith.constant 0 : index
    %c0_10 = arith.constant 0 : index
    %c0_11 = arith.constant 0 : index
    %12 = vector.load %arg6[%c0_9, %c0_10, %c0_11] : memref<1x8x512xbf16, #tpu.memory_space<vmem>>, vector<1x8x512xbf16>
    %13 = vector.shape_cast %12 : vector<1x8x512xbf16> to vector<8x512xbf16>
    %14 = vector.shape_cast %11 : vector<8x512xbf16> to vector<1x8x512xbf16>
    tpu.vector_store %arg6[%c0_9, %c0_10, %c0_11], %14 {strides = array<i32>} : memref<1x8x512xbf16, #tpu.memory_space<vmem>>, vector<1x8x512xbf16>,
    return
  }
  func.func @transform_0(%arg0: i32, %arg1: i32) -> (i32, i32, i32) {
    %c0_i32 = arith.constant 0 : i32
    %c0_i32_0 = arith.constant 0 : i32
    return %arg0, %c0_i32, %arg1 : i32, i32, i32
  }
  func.func @transform_1(%arg0: i32, %arg1: i32) -> (i32, i32) {
    %c0_i32 = arith.constant 0 : i32
    %c0_i32_0 = arith.constant 0 : i32
    %c0_i32_1 = arith.constant 0 : i32
    return %c0_i32, %c0_i32_0 : i32, i32
  }
  func.func @transform_2(%arg0: i32, %arg1: i32) -> (i32, i32) {
    %c0_i32 = arith.constant 0 : i32
    %c0_i32_0 = arith.constant 0 : i32
    %c0_i32_1 = arith.constant 0 : i32
    return %c0_i32, %c0_i32_0 : i32, i32
  }
  func.func @transform_3(%arg0: i32, %arg1: i32) -> (i32, i32, i32) {
    %c0_i32 = arith.constant 0 : i32
    %c0_i32_0 = arith.constant 0 : i32
    return %arg0, %c0_i32, %arg1 : i32, i32, i32
  }
  func.func @transform_4(%arg0: i32, %arg1: i32) -> (i32, i32, i32) {
    %c0_i32 = arith.constant 0 : i32
    %c0_i32_0 = arith.constant 0 : i32
    return %arg0, %c0_i32, %arg1 : i32, i32, i32
  }
}

module attributes {stable_mosaic.version = 11 : i64} {
  func.func @_conv_mm_kernel(%arg0: i32, %arg1: i32, %arg2: memref<1x72x512xbf16, #tpu.memory_space<vmem>>, %arg3: memref<16x72xbf16, #tpu.memory_space<vmem>>, %arg4: memref<16x1xf32, #tpu.memory_space<vmem>>, %arg5: memref<1x16x512xbf16, #tpu.memory_space<vmem>>) attributes {dimension_semantics = [#tpu.dimension_semantics<parallel>, #tpu.dimension_semantics<parallel>], iteration_bounds = array<i64: 2, 2>, scalar_prefetch = 0 : i64, scratch_operands = 0 : i64, tpu.core_type = #tpu.core_type<tc>, window_params = [{transform_indices = @transform_0, window_bounds = array<i64: 1, 72, 512>}, {pipeline_mode = #tpu.pipeline_mode<synchronous>, transform_indices = @transform_1, window_bounds = array<i64: 16, 72>}, {pipeline_mode = #tpu.pipeline_mode<synchronous>, transform_indices = @transform_2, window_bounds = array<i64: 16, 1>}, {transform_indices = @transform_3, window_bounds = array<i64: 1, 16, 512>}]} {
    %c0 = arith.constant 0 : index
    %c0_0 = arith.constant 0 : index
    %0 = vector.load %arg3[%c0, %c0_0] : memref<16x72xbf16, #tpu.memory_space<vmem>>, vector<16x72xbf16>
    %c0_1 = arith.constant 0 : index
    %c0_2 = arith.constant 0 : index
    %c0_3 = arith.constant 0 : index
    %1 = vector.load %arg2[%c0_1, %c0_2, %c0_3] : memref<1x72x512xbf16, #tpu.memory_space<vmem>>, vector<1x72x512xbf16>
    %2 = vector.shape_cast %1 : vector<1x72x512xbf16> to vector<72x512xbf16>
    %cst = arith.constant dense<0.000000e+00> : vector<16x512xf32>
    %3 = tpu.matmul %0, %2, %cst {dimension_numbers = #tpu.dot_dimension_numbers<[1], [0], [0], [1], [0, 0, 1, 1], [], []>} : vector<16x72xbf16>, vector<72x512xbf16>, vector<16x512xf32> -> vector<16x512xf32>
    %c0_4 = arith.constant 0 : index
    %c0_5 = arith.constant 0 : index
    %4 = vector.load %arg4[%c0_4, %c0_5] : memref<16x1xf32, #tpu.memory_space<vmem>>, vector<16x1xf32>
    %5 = vector.broadcast %4 : vector<16x1xf32> to vector<16x512xf32>
    %6 = arith.addf %3, %5 : vector<16x512xf32>
    %7 = arith.truncf %6 : vector<16x512xf32> to vector<16x512xbf16>
    %c0_6 = arith.constant 0 : index
    %c0_7 = arith.constant 0 : index
    %c0_8 = arith.constant 0 : index
    %8 = vector.load %arg5[%c0_6, %c0_7, %c0_8] : memref<1x16x512xbf16, #tpu.memory_space<vmem>>, vector<1x16x512xbf16>
    %9 = vector.shape_cast %8 : vector<1x16x512xbf16> to vector<16x512xbf16>
    %10 = vector.shape_cast %7 : vector<16x512xbf16> to vector<1x16x512xbf16>
    tpu.vector_store %arg5[%c0_6, %c0_7, %c0_8], %10 {strides = array<i32>} : memref<1x16x512xbf16, #tpu.memory_space<vmem>>, vector<1x16x512xbf16>,
    return
  }
  func.func @transform_0(%arg0: i32, %arg1: i32) -> (i32, i32, i32) {
    %c0_i32 = arith.constant 0 : i32
    %c0_i32_0 = arith.constant 0 : i32
    return %arg0, %c0_i32, %arg1 : i32, i32, i32
  }
  func.func @transform_1(%arg0: i32, %arg1: i32) -> (i32, i32) {
    %c0_i32 = arith.constant 0 : i32
    %c0_i32_0 = arith.constant 0 : i32
    %c0_i32_1 = arith.constant 0 : i32
    return %c0_i32, %c0_i32_0 : i32, i32
  }
  func.func @transform_2(%arg0: i32, %arg1: i32) -> (i32, i32) {
    %c0_i32 = arith.constant 0 : i32
    %c0_i32_0 = arith.constant 0 : i32
    %c0_i32_1 = arith.constant 0 : i32
    return %c0_i32, %c0_i32_0 : i32, i32
  }
  func.func @transform_3(%arg0: i32, %arg1: i32) -> (i32, i32, i32) {
    %c0_i32 = arith.constant 0 : i32
    %c0_i32_0 = arith.constant 0 : i32
    return %arg0, %c0_i32, %arg1 : i32, i32, i32
  }
}

module attributes {stable_mosaic.version = 11 : i64} {
  func.func @_conv_mm_kernel(%arg0: i32, %arg1: i32, %arg2: memref<1x144x512xbf16, #tpu.memory_space<vmem>>, %arg3: memref<16x144xbf16, #tpu.memory_space<vmem>>, %arg4: memref<16x1xf32, #tpu.memory_space<vmem>>, %arg5: memref<1x16x512xbf16, #tpu.memory_space<vmem>>) attributes {dimension_semantics = [#tpu.dimension_semantics<parallel>, #tpu.dimension_semantics<parallel>], iteration_bounds = array<i64: 2, 2>, scalar_prefetch = 0 : i64, scratch_operands = 0 : i64, tpu.core_type = #tpu.core_type<tc>, window_params = [{transform_indices = @transform_0, window_bounds = array<i64: 1, 144, 512>}, {pipeline_mode = #tpu.pipeline_mode<synchronous>, transform_indices = @transform_1, window_bounds = array<i64: 16, 144>}, {pipeline_mode = #tpu.pipeline_mode<synchronous>, transform_indices = @transform_2, window_bounds = array<i64: 16, 1>}, {transform_indices = @transform_3, window_bounds = array<i64: 1, 16, 512>}]} {
    %c0 = arith.constant 0 : index
    %c0_0 = arith.constant 0 : index
    %0 = vector.load %arg3[%c0, %c0_0] : memref<16x144xbf16, #tpu.memory_space<vmem>>, vector<16x144xbf16>
    %c0_1 = arith.constant 0 : index
    %c0_2 = arith.constant 0 : index
    %c0_3 = arith.constant 0 : index
    %1 = vector.load %arg2[%c0_1, %c0_2, %c0_3] : memref<1x144x512xbf16, #tpu.memory_space<vmem>>, vector<1x144x512xbf16>
    %2 = vector.shape_cast %1 : vector<1x144x512xbf16> to vector<144x512xbf16>
    %cst = arith.constant dense<0.000000e+00> : vector<16x512xf32>
    %3 = tpu.matmul %0, %2, %cst {dimension_numbers = #tpu.dot_dimension_numbers<[1], [0], [0], [1], [0, 0, 1, 1], [], []>} : vector<16x144xbf16>, vector<144x512xbf16>, vector<16x512xf32> -> vector<16x512xf32>
    %c0_4 = arith.constant 0 : index
    %c0_5 = arith.constant 0 : index
    %4 = vector.load %arg4[%c0_4, %c0_5] : memref<16x1xf32, #tpu.memory_space<vmem>>, vector<16x1xf32>
    %5 = vector.broadcast %4 : vector<16x1xf32> to vector<16x512xf32>
    %6 = arith.addf %3, %5 : vector<16x512xf32>
    %7 = arith.truncf %6 : vector<16x512xf32> to vector<16x512xbf16>
    %c0_6 = arith.constant 0 : index
    %c0_7 = arith.constant 0 : index
    %c0_8 = arith.constant 0 : index
    %8 = vector.load %arg5[%c0_6, %c0_7, %c0_8] : memref<1x16x512xbf16, #tpu.memory_space<vmem>>, vector<1x16x512xbf16>
    %9 = vector.shape_cast %8 : vector<1x16x512xbf16> to vector<16x512xbf16>
    %10 = vector.shape_cast %7 : vector<16x512xbf16> to vector<1x16x512xbf16>
    tpu.vector_store %arg5[%c0_6, %c0_7, %c0_8], %10 {strides = array<i32>} : memref<1x16x512xbf16, #tpu.memory_space<vmem>>, vector<1x16x512xbf16>,
    return
  }
  func.func @transform_0(%arg0: i32, %arg1: i32) -> (i32, i32, i32) {
    %c0_i32 = arith.constant 0 : i32
    %c0_i32_0 = arith.constant 0 : i32
    return %arg0, %c0_i32, %arg1 : i32, i32, i32
  }
  func.func @transform_1(%arg0: i32, %arg1: i32) -> (i32, i32) {
    %c0_i32 = arith.constant 0 : i32
    %c0_i32_0 = arith.constant 0 : i32
    %c0_i32_1 = arith.constant 0 : i32
    return %c0_i32, %c0_i32_0 : i32, i32
  }
  func.func @transform_2(%arg0: i32, %arg1: i32) -> (i32, i32) {
    %c0_i32 = arith.constant 0 : i32
    %c0_i32_0 = arith.constant 0 : i32
    %c0_i32_1 = arith.constant 0 : i32
    return %c0_i32, %c0_i32_0 : i32, i32
  }
  func.func @transform_3(%arg0: i32, %arg1: i32) -> (i32, i32, i32) {
    %c0_i32 = arith.constant 0 : i32
    %c0_i32_0 = arith.constant 0 : i32
    return %arg0, %c0_i32, %arg1 : i32, i32, i32
  }
}

module attributes {stable_mosaic.version = 11 : i64} {
  func.func @_conv_mm_kernel(%arg0: i32, %arg1: i32, %arg2: memref<1x72x512xbf16, #tpu.memory_space<vmem>>, %arg3: memref<16x72xbf16, #tpu.memory_space<vmem>>, %arg4: memref<16x1xf32, #tpu.memory_space<vmem>>, %arg5: memref<1x16x512xbf16, #tpu.memory_space<vmem>>, %arg6: memref<1x16x512xf32, #tpu.memory_space<vmem>>) attributes {dimension_semantics = [#tpu.dimension_semantics<parallel>, #tpu.dimension_semantics<parallel>], iteration_bounds = array<i64: 2, 2>, scalar_prefetch = 0 : i64, scratch_operands = 0 : i64, tpu.core_type = #tpu.core_type<tc>, window_params = [{transform_indices = @transform_0, window_bounds = array<i64: 1, 72, 512>}, {pipeline_mode = #tpu.pipeline_mode<synchronous>, transform_indices = @transform_1, window_bounds = array<i64: 16, 72>}, {pipeline_mode = #tpu.pipeline_mode<synchronous>, transform_indices = @transform_2, window_bounds = array<i64: 16, 1>}, {transform_indices = @transform_3, window_bounds = array<i64: 1, 16, 512>}, {transform_indices = @transform_4, window_bounds = array<i64: 1, 16, 512>}]} {
    %c0 = arith.constant 0 : index
    %c0_0 = arith.constant 0 : index
    %0 = vector.load %arg3[%c0, %c0_0] : memref<16x72xbf16, #tpu.memory_space<vmem>>, vector<16x72xbf16>
    %c0_1 = arith.constant 0 : index
    %c0_2 = arith.constant 0 : index
    %c0_3 = arith.constant 0 : index
    %1 = vector.load %arg2[%c0_1, %c0_2, %c0_3] : memref<1x72x512xbf16, #tpu.memory_space<vmem>>, vector<1x72x512xbf16>
    %2 = vector.shape_cast %1 : vector<1x72x512xbf16> to vector<72x512xbf16>
    %cst = arith.constant dense<0.000000e+00> : vector<16x512xf32>
    %3 = tpu.matmul %0, %2, %cst {dimension_numbers = #tpu.dot_dimension_numbers<[1], [0], [0], [1], [0, 0, 1, 1], [], []>} : vector<16x72xbf16>, vector<72x512xbf16>, vector<16x512xf32> -> vector<16x512xf32>
    %c0_4 = arith.constant 0 : index
    %c0_5 = arith.constant 0 : index
    %4 = vector.load %arg4[%c0_4, %c0_5] : memref<16x1xf32, #tpu.memory_space<vmem>>, vector<16x1xf32>
    %5 = vector.broadcast %4 : vector<16x1xf32> to vector<16x512xf32>
    %6 = arith.addf %3, %5 : vector<16x512xf32>
    %c0_6 = arith.constant 0 : index
    %c0_7 = arith.constant 0 : index
    %c0_8 = arith.constant 0 : index
    %7 = vector.load %arg5[%c0_6, %c0_7, %c0_8] : memref<1x16x512xbf16, #tpu.memory_space<vmem>>, vector<1x16x512xbf16>
    %8 = vector.shape_cast %7 : vector<1x16x512xbf16> to vector<16x512xbf16>
    %9 = arith.extf %8 : vector<16x512xbf16> to vector<16x512xf32>
    %10 = arith.addf %6, %9 : vector<16x512xf32>
    %c0_9 = arith.constant 0 : index
    %c0_10 = arith.constant 0 : index
    %c0_11 = arith.constant 0 : index
    %11 = vector.load %arg6[%c0_9, %c0_10, %c0_11] : memref<1x16x512xf32, #tpu.memory_space<vmem>>, vector<1x16x512xf32>
    %12 = vector.shape_cast %11 : vector<1x16x512xf32> to vector<16x512xf32>
    %13 = vector.shape_cast %10 : vector<16x512xf32> to vector<1x16x512xf32>
    tpu.vector_store %arg6[%c0_9, %c0_10, %c0_11], %13 {strides = array<i32>} : memref<1x16x512xf32, #tpu.memory_space<vmem>>, vector<1x16x512xf32>,
    return
  }
  func.func @transform_0(%arg0: i32, %arg1: i32) -> (i32, i32, i32) {
    %c0_i32 = arith.constant 0 : i32
    %c0_i32_0 = arith.constant 0 : i32
    return %arg0, %c0_i32, %arg1 : i32, i32, i32
  }
  func.func @transform_1(%arg0: i32, %arg1: i32) -> (i32, i32) {
    %c0_i32 = arith.constant 0 : i32
    %c0_i32_0 = arith.constant 0 : i32
    %c0_i32_1 = arith.constant 0 : i32
    return %c0_i32, %c0_i32_0 : i32, i32
  }
  func.func @transform_2(%arg0: i32, %arg1: i32) -> (i32, i32) {
    %c0_i32 = arith.constant 0 : i32
    %c0_i32_0 = arith.constant 0 : i32
    %c0_i32_1 = arith.constant 0 : i32
    return %c0_i32, %c0_i32_0 : i32, i32
  }
  func.func @transform_3(%arg0: i32, %arg1: i32) -> (i32, i32, i32) {
    %c0_i32 = arith.constant 0 : i32
    %c0_i32_0 = arith.constant 0 : i32
    return %arg0, %c0_i32, %arg1 : i32, i32, i32
  }
  func.func @transform_4(%arg0: i32, %arg1: i32) -> (i32, i32, i32) {
    %c0_i32 = arith.constant 0 : i32
    %c0_i32_0 = arith.constant 0 : i32
    return %arg0, %c0_i32, %arg1 : i32, i32, i32
  }
}

</mosaic_0001>

<bundles_post_ra>
// kernel: upsample_block_forward.4
= control target key start
LH: loop header
LB: loop body
LE: loop exit
PB: predicated region body
PF: predicated region fallthrough
CT: control target
= control target key end

     0   :  { %s764_s15 = smov 0   ;;  %s766_s16 = smov 0   ;;  %s887_s0 = inlined_call_operand.vmem [shape: bf16[2,36,1024], index: 0, kind: input, shape index: {}]   ;;  %s888_s1 = inlined_call_operand.vmem [shape: bf16[8,36], index: 1, kind: input, shape index: {}]   ;;  %s889_s2 = inlined_call_operand.vmem [shape: f32[8,1], index: 2, kind: input, shape index: {}]   ;;  %s890_s3 = inlined_call_operand.vmem [shape: bf16[2,8,1024], index: 3, kind: input, shape index: {}]   ;;  %s891_s4 = inlined_call_operand.vmem [shape: bf16[2,8,1024], index: 4, kind: output, shape index: {}]  }
   0x1   :  { %s768_s17 = smov 0   ;;  %s770_s18 = smov 0  }
   0x2   :  { %s772_s19 = smov 0   ;;  %s774_s20 = smov 0  }
   0x3   :  { %s776_s21 = smov 0  }
   0x4 LB: > { %s23_s22 = sadd.s32 1, %s728_s19  ;;  %s26_s23 = sadd.s32 1, %s732_s20  ;;  %s736_s21 = sphi %s776_s21, %s14_s21   ;;  %s732_s20 = sphi %s774_s20, %s897_s20   ;;  %s728_s19 = sphi %s772_s19, %s896_s19   ;;  %s724_s18 = sphi %s770_s18, %s895_s18   ;;  %s720_s17 = sphi %s768_s17, %s894_s17   ;;  %s716_s16 = sphi %s766_s16, %s893_s16   ;;  %s712_s15 = sphi %s764_s15, %s892_s15  }
   0x5   : > { %p24_p0 = scmp.ge.s32.totalorder %s23_s22, 2  ;;  %p42_p1 = scmp.ne.s32.totalorder %s716_s16, %s712_s15 }
   0x6   : > { %p43_p2 = scmp.eq.s32.totalorder %s736_s21, 0  ;;  %s35_s27 = sadd.s32 1, %s716_s16 }
   0x7   : > { %s899_s22 = smov (%p24_p0, %s23_s22), 0  ;;  %s901_s23 = smov (!%p24_p0, %s26_s23), %s732_s20 }
   0x8   : > { %p44_p3 = por %p43_p2, %p42_p1  ;;  %p28_p4 = scmp.ge.s32.totalorder %s901_s23, 2 }
   0x9   : > { %s31_s24 = ssub.s32 %s728_s19, %s899_s22  ;;  %p565_p6 = scmp.ge.s32.totalorder %s736_s21, 4 }
   0xa   : > { %s903_s23 = smov (%p28_p4, %s901_s23), 0 }
   0xb   : > { %s30_s25 = ssub.s32 %s732_s20, %s903_s23  ;;  %172 = sbr.rel (%p565_p6) target bundleno = 34 (0x22), region = 24 }
   0xc   : > { %s32_s26 = sor.u32 %s31_s24, %s30_s25 }
   0xd   : > { %p33_p5 = scmp.eq.s32.totalorder %s32_s26, 0 }
   0xf   : > { %s815_s28 = scalar_select %p33_p5, %s716_s16, %s35_s27  }
  0x10   : > { %175 = sbr.rel (!%p44_p3) target bundleno = 34 (0x22), region = 28  ;;  %s177_s29 = sand.u32 (%p44_p3), 1, %s716_s16  }
  0x11   : > { %s621_s30 = smul.u32 (%p44_p3), 80, %s177_s29  ;;  %s566_s5 = sshll.u32 (%p44_p3), %s728_s19, 2 }
  0x12   : > { %s622_s6 = smul.u32 (%p44_p3), 40, %s732_s20 }
  0x13   : > { %s179_s12 = scalar_lea.vmem (%p44_p3), [#allocation2], %s621_s30 }
  0x14   : > { %s182_s7 = sadd.s32 (%p44_p3), %s622_s6, %s566_s5 }
  0x15   : > { %s567_s8 = sshll.u32 %s182_s7, 2 }
  0x16   : > { %s184_s11 = scalar_lea.vmem %s887_s0, %s567_s8 }
  0x17   : > { %v197_v0 = vld [vmem:[%s184_s11] sm:$0xff]  ;;  %v199_v1 = vld [vmem:[%s184_s11 + $0x8] sm:$0xff] }
  0x18   : > { %v201_v2 = vld [vmem:[%s184_s11 + $0x20] sm:$0xff]  ;;  %198 = vst [vmem:[%s179_s12] sm:$0xff] %v197_v0  ;;  %v203_v3 = vld [vmem:[%s184_s11 + $0x28] sm:$0xff] }
  0x19   : > { %200 = vst [vmem:[%s179_s12 + $0x8] sm:$0xff] %v199_v1  ;;  %v205_v4 = vld [vmem:[%s184_s11 + $0x40] sm:$0xff]  ;;  %v207_v5 = vld [vmem:[%s184_s11 + $0x48] sm:$0xff] }
  0x1a   : > { %202 = vst [vmem:[%s179_s12 + $0x10] sm:$0xff] %v201_v2  ;;  %v209_v6 = vld [vmem:[%s184_s11 + $0x60] sm:$0xff]  ;;  %v211_v7 = vld [vmem:[%s184_s11 + $0x68] sm:$0xff] }
  0x1b   : > { %204 = vst [vmem:[%s179_s12 + $0x18] sm:$0xff] %v203_v3  ;;  %v213_v8 = vld [vmem:[%s184_s11 + $0x80] sm:$0xff]  ;;  %v215_v9 = vld [vmem:[%s184_s11 + $0x88] sm:$0xff] }
  0x1c   : > { %206 = vst [vmem:[%s179_s12 + $0x20] sm:$0xff] %v205_v4 }
  0x1d   : > { %208 = vst [vmem:[%s179_s12 + $0x28] sm:$0xff] %v207_v5 }
  0x1e   : > { %210 = vst [vmem:[%s179_s12 + $0x30] sm:$0xff] %v209_v6 }
  0x1f   : > { %212 = vst [vmem:[%s179_s12 + $0x38] sm:$0xff] %v211_v7 }
  0x20   : > { %214 = vst [vmem:[%s179_s12 + $0x40] sm:$0xff] %v213_v8 }
  0x21   : > { %216 = vst [vmem:[%s179_s12 + $0x48] sm:$0xff] %v215_v9 }
  0x22 PF: > { %p568_p7 = scmp.ge.s32.totalorder %s736_s21, 1  ;;  %p234_p8 = scmp.lt.s32.totalorder %s736_s21, 5 }
  0x24   : > { %p235_p9 = pnand %p568_p7, %p234_p8 }
  0x25   : > { %s241_s13 = sand.u32 (!%p235_p9), 1, %s712_s15   ;;  %s569_s29 = sshll.u32 (!%p235_p9), %s720_s17, 2 }
  0x26   : > { %238 = sbr.rel (%p235_p9) target bundleno = 200 (0xc8), region = 55  ;;  %p281_p10 = scmp.lt.s32.totalorder (!%p235_p9), %s724_s18, 1 }
  0x27   : > { %s623_s14 = smul.u32 (!%p235_p9), 80, %s241_s13  ;;  %p283_p11 = scmp.lt.s32.totalorder (!%p235_p9), %s569_s29, 7 }
  0x29   : > { %s830_s26 = scalar_lea.vmem (!%p235_p9), [#allocation2], %s623_s14 }
  0x2b   : > { %v738_v10 = vmov 0   ;;  %v312_v11 = vld [vmem:[%s889_s2] sm:$0xff]  ;;  %v311_v13 = vld [vmem:[%s830_s26 + $0x48] sm:$0x33]  ;;  %vm372_vm0 = vcmask 1041408   ;;  %vm368_vm1 = vcmask 293888  }
  0x2c   : > { %681 = vset.pattern.permute.xlu0 %v738_v10  ;;  %v310_v12 = vld [vmem:[%s830_s26 + $0x40] sm:$0x33]  ;;  %v346_v16 = vunpack.c.l.b16 %v311_v13  ;;  %v347_v17 = vunpack.c.h.b16 %v311_v13  ;;  %v619_v19 = vld [vmem:[%s830_s26 + $0x2c] sm:$0xf0]  ;;  %v595_v25 = vld [vmem:[%s830_s26 + $0x30] sm:$0xf0] }
  0x2d   : > { %315 = vperm.xlu0 %681, %v312_v11   ;;  %v344_v14 = vunpack.c.l.b16 %v310_v12  ;;  %v345_v15 = vunpack.c.h.b16 %v310_v12  ;;  %v593_v18 = vld [vmem:[%s830_s26 + $0x20] sm:$0xf]  ;;  %v617_v24 = vld [vmem:[%s830_s26 + $0x24] sm:$0xf]  ;;  %v601_v26 = vld [vmem:[%s830_s26 + $0x28] sm:$0xf] }
  0x2e   : > { %v358_v22 = vpack.c.b16 %v346_v16, %v346_v16  ;;  %v359_v23 = vpack.c.b16 %v347_v17, %v347_v17  ;;  %v620_v27 = vld [vmem:[%s830_s26 + $0x34] sm:$0xf0]  ;;  %v618_v28 = vld [vmem:[%s830_s26 + $0x2c] sm:$0xf]  ;;  %v603_v29 = vld [vmem:[%s830_s26 + $0x38] sm:$0xf0]  ;;  %v594_v34 = vor.u32 %v619_v19, %v593_v18  ;;  %v598_v35 = vor.u32 %v617_v24, %v595_v25 }
  0x2f   : > { %v356_v20 = vpack.c.b16 %v344_v14, %v344_v14  ;;  %v357_v21 = vpack.c.b16 %v345_v15, %v345_v15  ;;  %v577_v36 = vld [vmem:[%s830_s26] sm:$0xf]  ;;  %v615_v37 = vld [vmem:[%s830_s26 + $0xc] sm:$0xf0]  ;;  %v602_v38 = vor.u32 %v620_v27, %v601_v26  ;;  %v606_v39 = vor.u32 %v618_v28, %v603_v29  ;;  %v613_v40 = vld [vmem:[%s830_s26 + $0x4] sm:$0xf] }
  0x30   : > { %v380_v32 = vsel %vm372_vm0, %v358_v22, 0  ;;  %v383_v33 = vsel %vm372_vm0, %v359_v23, 0  ;;  %v579_v41 = vld [vmem:[%s830_s26 + $0x10] sm:$0xf0]  ;;  %v585_v42 = vld [vmem:[%s830_s26 + $0x8] sm:$0xf]  ;;  %v578_v46 = vor.u32 %v615_v37, %v577_v36 }
  0x31   : > { %v374_v30 = vsel %vm372_vm0, %v356_v20, 0  ;;  %v377_v31 = vsel %vm372_vm0, %v357_v21, 0  ;;  %416 = vmatpush.bf16.msra.mxu2 %v380_v32  ;;  %429 = vmatpush.bf16.msra.mxu3 %v383_v33  ;;  %v616_v43 = vld [vmem:[%s830_s26 + $0x14] sm:$0xf0]  ;;  %v614_v44 = vld [vmem:[%s830_s26 + $0xc] sm:$0xf]  ;;  %v582_v47 = vor.u32 %v613_v40, %v579_v41 }
  0x32   : > { %390 = vmatpush.bf16.msra.mxu0 %v374_v30  ;;  %403 = vmatpush.bf16.msra.mxu1 %v377_v31  ;;  %v587_v45 = vld [vmem:[%s830_s26 + $0x18] sm:$0xf0]  ;;  %v586_v48 = vor.u32 %v616_v43, %v585_v42  ;;  %v301_v50 = vld [vmem:[%s888_s1] sm:$0xf]  ;;  %s905_s18 = smov (!%p281_p10, %s724_s18), 1  ;;  %s907_s29 = smov (!%p283_p11, %s569_s29), 7 }
  0x33   : > { %v590_v49 = vor.u32 %v614_v44, %v587_v45  ;;  %s570_s30 = sshll.u32 %s905_s18, 3 }
  0x34   : > { %s286_s5 = sadd.s32 %s570_s30, %s907_s29 }
  0x35   : > { %417 = vmatpush.bf16.msra.mxu2 %v602_v38  ;;  %430 = vmatpush.bf16.msra.mxu3 %v606_v39  ;;  %s571_s6 = sshll.u32 %s286_s5, 2 }
  0x36   : > { %391 = vmatpush.bf16.msra.mxu0 %v594_v34  ;;  %404 = vmatpush.bf16.msra.mxu1 %v598_v35  ;;  %s288_s9 = scalar_lea.vmem %s890_s3, %s571_s6  ;;  %s298_s18 = scalar_lea.vmem %s891_s4, %s571_s6 }
  0x37   : > { %v437_v51 = vld [vmem:[%s288_s9] sm:$0xff]  ;;  %v438_v61 = vld [vmem:[%s288_s9 + $0x8] sm:$0xff] }
  0x38   : > { %v439_v53 = vunpack.c.l.bf16 %v437_v51  ;;  %v440_v54 = vunpack.c.h.bf16 %v437_v51  ;;  %v441_v63 = vunpack.c.l.bf16 %v438_v61  ;;  %v442_v0 = vunpack.c.h.bf16 %v438_v61 }
  0x39   : > { %418 = vmatpush.bf16.msra.mxu2 %v586_v48  ;;  %431 = vmatpush.bf16.msra.mxu3 %v590_v49 }
  0x3a   : > { %392 = vmatpush.bf16.msra.mxu0 %v578_v46  ;;  %405 = vmatpush.bf16.msra.mxu1 %v582_v47 }
  0x3c   : > { %609 = vmatmul.msk.bf16.vlgmr.msra.gmra.mxu2 %vm368_vm1, %v301_v50  ;;  %610 = vmatmul.msk.bf16.vlgmr.msra.gmra.mxu3 %vm368_vm1, %v301_v50 }
  0x3d   : > { %607 = vmatmul.msk.bf16.vlgmr.msra.gmra.mxu0 %vm368_vm1, %v301_v50  ;;  %608 = vmatmul.msk.bf16.vlgmr.msra.gmra.mxu1 %vm368_vm1, %v301_v50 }
  0x9f   : > { %v316_v52 = vpop.permute.xlu0 %315 }
  0xba   : > { %v394_v55 = vpop.f32.mrf.mxu0  ;;  %v407_v56 = vpop.f32.mrf.mxu1 }
  0xbb   : > { %v395_v57 = vadd.f32 %v394_v55, %v316_v52  ;;  %v408_v58 = vadd.f32 %v407_v56, %v316_v52 }
  0xbd   : > { %v443_v59 = vadd.f32 %v439_v53, %v395_v57  ;;  %v444_v60 = vadd.f32 %v440_v54, %v408_v58 }
  0xbf   : > { %v447_v62 = vpack.c.bf16 %v444_v60, %v443_v59  ;;  %v420_v1 = vpop.f32.mrf.mxu2  ;;  %v433_v2 = vpop.f32.mrf.mxu3 }
  0xc0   : > { %v421_v3 = vadd.f32 %v420_v1, %v316_v52  ;;  %v434_v4 = vadd.f32 %v433_v2, %v316_v52 }
  0xc1   : > { %449 = vst [vmem:[%s298_s18] sm:$0xff] %v447_v62 }
  0xc2   : > { %v396_v5 = vpop.f32.mrf.mxu0  ;;  %v409_v6 = vpop.f32.mrf.mxu1  ;;  %v445_v7 = vadd.f32 %v441_v63, %v421_v3  ;;  %v446_v8 = vadd.f32 %v442_v0, %v434_v4 }
  0xc4   : > { %v448_v9 = vpack.c.bf16 %v446_v8, %v445_v7 }
  0xc6   : > { %450 = vst [vmem:[%s298_s18 + $0x8] sm:$0xff] %v448_v9 }
  0xc7   : > { %v422_v10 = vpop.f32.mrf.mxu2  ;;  %v435_v11 = vpop.f32.mrf.mxu3 }
  0xc8 PF: > { %s14_s21 = sadd.s32 1, %s736_s21   ;;  %s892_s15 = smov %s716_s16 }
  0xc9   : > { %p11_p12 = scmp.ge.s32.totalorder %s14_s21, 6   ;;  %s893_s16 = smov %s815_s28 }
  0xca   : > { %s894_s17 = smov %s728_s19  ;;  %s895_s18 = smov %s732_s20 }
  0xcb   : > { %s896_s19 = smov %s899_s22  ;;  %s897_s20 = smov %s903_s23 }
  0xcc   :  { %13 = sbr.rel (!%p11_p12) target bundleno = 4 (0x4), region = 97 }

// kernel: upsample_block_forward.5
= control target key start
LH: loop header
LB: loop body
LE: loop exit
PB: predicated region body
PF: predicated region fallthrough
CT: control target
= control target key end

     0   :  { %s798_s12 = smov 0   ;;  %s800_s13 = smov 0   ;;  %s997_s0 = inlined_call_operand.vmem [shape: bf16[2,72,1024], index: 0, kind: input, shape index: {}]   ;;  %s998_s1 = inlined_call_operand.vmem [shape: bf16[16,72], index: 1, kind: input, shape index: {}]   ;;  %s999_s2 = inlined_call_operand.vmem [shape: f32[16,1], index: 2, kind: input, shape index: {}]   ;;  %s1000_s3 = inlined_call_operand.vmem [shape: bf16[2,16,1024], index: 3, kind: output, shape index: {}]  }
   0x1   :  { %s802_s14 = smov 0   ;;  %s804_s15 = smov 0  }
   0x2   :  { %s806_s16 = smov 0   ;;  %s808_s17 = smov 0  }
   0x3   :  { %s810_s18 = smov 0  }
   0x4 LB: > { %s22_s19 = sadd.s32 1, %s767_s16  ;;  %s25_s20 = sadd.s32 1, %s771_s17  ;;  %s775_s18 = sphi %s810_s18, %s13_s18   ;;  %s771_s17 = sphi %s808_s17, %s1007_s17   ;;  %s767_s16 = sphi %s806_s16, %s1006_s16   ;;  %s763_s15 = sphi %s804_s15, %s1005_s15   ;;  %s759_s14 = sphi %s802_s14, %s1004_s14   ;;  %s755_s13 = sphi %s800_s13, %s1003_s13   ;;  %s751_s12 = sphi %s798_s12, %s1002_s12  }
   0x5   : > { %p23_p0 = scmp.ge.s32.totalorder %s22_s19, 2  ;;  %s557_s21 = sadd.s32 4294967295, %s775_s18  }
   0x6   : > { %p41_p1 = scmp.ne.s32.totalorder %s755_s13, %s751_s12  ;;  %p42_p2 = scmp.eq.s32.totalorder %s775_s18, 0 }
   0x7   : > { %s1009_s19 = smov (%p23_p0, %s22_s19), 0  ;;  %s1011_s20 = smov (!%p23_p0, %s25_s20), %s771_s17 }
   0x8   : > { %p27_p3 = scmp.ge.s32.totalorder %s1011_s20, 2  ;;  %p115_p4 = scmp.eq.s32.totalorder %s557_s21, 3 }
   0x9   : > { %s30_s22 = ssub.s32 %s767_s16, %s1009_s19  ;;  %p43_p5 = por %p42_p2, %p41_p1 }
   0xa   : > { %s1013_s20 = smov (%p27_p3, %s1011_s20), 0  ;;  %p846_p6 = por %p115_p4, %p41_p1 }
   0xb   : > { %s29_s24 = ssub.s32 %s771_s17, %s1013_s20  ;;  %s34_s26 = sadd.s32 1, %s755_s13 }
   0xc   : > { %s31_s25 = sor.u32 %s30_s22, %s29_s24  ;;  %p560_p8 = scmp.ge.s32.totalorder %s775_s18, 4 }
   0xd   : > { %p32_p7 = scmp.eq.s32.totalorder %s31_s25, 0 }
   0xe   : > { %143 = sbr.rel (%p560_p8) target bundleno = 45 (0x2d), region = 24 }
   0xf   : > { %s854_s27 = scalar_select %p32_p7, %s755_s13, %s34_s26  }
  0x13   : > { %146 = sbr.rel (!%p43_p5) target bundleno = 45 (0x2d), region = 28  ;;  %s148_s28 = sand.u32 (%p43_p5), 1, %s755_s13  }
  0x14   : > { %s660_s29 = smul.u32 (%p43_p5), 144, %s148_s28  ;;  %s561_s30 = sshll.u32 (%p43_p5), %s767_s16, 2 }
  0x15   : > { %s661_s4 = smul.u32 (%p43_p5), 72, %s771_s17 }
  0x16   : > { %s868_s10 = scalar_lea.vmem (%p43_p5), [#allocation2], %s660_s29 }
  0x17   : > { %s153_s5 = sadd.s32 (%p43_p5), %s661_s4, %s561_s30 }
  0x18   : > { %s562_s6 = sshll.u32 %s153_s5, 2 }
  0x19   : > { %s863_s9 = scalar_lea.vmem %s997_s0, %s562_s6 }
  0x1a   : > { %v168_v0 = vld [vmem:[%s863_s9] sm:$0xff]  ;;  %v170_v1 = vld [vmem:[%s863_s9 + $0x8] sm:$0xff] }
  0x1b   : > { %v172_v2 = vld [vmem:[%s863_s9 + $0x20] sm:$0xff]  ;;  %169 = vst [vmem:[%s868_s10] sm:$0xff] %v168_v0  ;;  %v174_v3 = vld [vmem:[%s863_s9 + $0x28] sm:$0xff] }
  0x1c   : > { %171 = vst [vmem:[%s868_s10 + $0x8] sm:$0xff] %v170_v1  ;;  %v176_v4 = vld [vmem:[%s863_s9 + $0x40] sm:$0xff]  ;;  %v178_v5 = vld [vmem:[%s863_s9 + $0x48] sm:$0xff] }
  0x1d   : > { %173 = vst [vmem:[%s868_s10 + $0x10] sm:$0xff] %v172_v2  ;;  %v180_v6 = vld [vmem:[%s863_s9 + $0x60] sm:$0xff]  ;;  %v182_v7 = vld [vmem:[%s863_s9 + $0x68] sm:$0xff] }
  0x1e   : > { %175 = vst [vmem:[%s868_s10 + $0x18] sm:$0xff] %v174_v3  ;;  %v184_v8 = vld [vmem:[%s863_s9 + $0x80] sm:$0xff]  ;;  %v186_v9 = vld [vmem:[%s863_s9 + $0x88] sm:$0xff] }
  0x1f   : > { %177 = vst [vmem:[%s868_s10 + $0x20] sm:$0xff] %v176_v4  ;;  %v188_v10 = vld [vmem:[%s863_s9 + $0xa0] sm:$0xff]  ;;  %v190_v11 = vld [vmem:[%s863_s9 + $0xa8] sm:$0xff] }
  0x20   : > { %179 = vst [vmem:[%s868_s10 + $0x28] sm:$0xff] %v178_v5  ;;  %v192_v12 = vld [vmem:[%s863_s9 + $0xc0] sm:$0xff]  ;;  %v194_v13 = vld [vmem:[%s863_s9 + $0xc8] sm:$0xff] }
  0x21   : > { %181 = vst [vmem:[%s868_s10 + $0x30] sm:$0xff] %v180_v6  ;;  %v196_v14 = vld [vmem:[%s863_s9 + $0xe0] sm:$0xff]  ;;  %v198_v15 = vld [vmem:[%s863_s9 + $0xe8] sm:$0xff] }
  0x22   : > { %183 = vst [vmem:[%s868_s10 + $0x38] sm:$0xff] %v182_v7  ;;  %v200_v16 = vld [vmem:[%s863_s9 + $0x100] sm:$0xff]  ;;  %v202_v17 = vld [vmem:[%s863_s9 + $0x108] sm:$0xff] }
  0x23   : > { %185 = vst [vmem:[%s868_s10 + $0x40] sm:$0xff] %v184_v8 }
  0x24   : > { %187 = vst [vmem:[%s868_s10 + $0x48] sm:$0xff] %v186_v9 }
  0x25   : > { %189 = vst [vmem:[%s868_s10 + $0x50] sm:$0xff] %v188_v10 }
  0x26   : > { %191 = vst [vmem:[%s868_s10 + $0x58] sm:$0xff] %v190_v11 }
  0x27   : > { %193 = vst [vmem:[%s868_s10 + $0x60] sm:$0xff] %v192_v12 }
  0x28   : > { %195 = vst [vmem:[%s868_s10 + $0x68] sm:$0xff] %v194_v13 }
  0x29   : > { %197 = vst [vmem:[%s868_s10 + $0x70] sm:$0xff] %v196_v14 }
  0x2a   : > { %199 = vst [vmem:[%s868_s10 + $0x78] sm:$0xff] %v198_v15 }
  0x2b   : > { %201 = vst [vmem:[%s868_s10 + $0x80] sm:$0xff] %v200_v16 }
  0x2c   : > { %203 = vst [vmem:[%s868_s10 + $0x88] sm:$0xff] %v202_v17 }
  0x2d PF: > { %p563_p9 = scmp.ge.s32.totalorder %s775_s18, 1  ;;  %p208_p10 = scmp.lt.s32.totalorder %s775_s18, 5 }
  0x2f   : > { %p209_p11 = pnand %p563_p9, %p208_p10 }
  0x30   : > { %s215_s11 = sand.u32 (!%p209_p11), 1, %s751_s12  }
  0x31   : > { %212 = sbr.rel (%p209_p11) target bundleno = 234 (0xea), region = 51  ;;  %s564_s4 = sshll.u32 (!%p209_p11), %s215_s11, 5 }
  0x32   : > { %s662_s24 = smul.u32 (!%p209_p11), 144, %s215_s11  ;;  %s959_s5 = scalar_lea.vmem (!%p209_p11), [#allocation3], %s564_s4 }
  0x34   : > { %s911_s25 = scalar_lea.vmem (!%p209_p11), [#allocation2], %s662_s24 }
  0x36   : > { %v260_v18 = vld [vmem:[%s999_s2] sm:$0xff]  ;;  %v777_v19 = vmov 0   ;;  %v259_v21 = vld [vmem:[%s911_s25 + $0x88] sm:$0xff]  ;;  %vm371_vm0 = vcmask 1043456   ;;  %v659_v35 = vld [vmem:[%s911_s25 + $0x74] sm:$0xf0] }
  0x37   : > { %720 = vset.pattern.permute.xlu0 %v777_v19  ;;  %v258_v20 = vld [vmem:[%s911_s25 + $0x80] sm:$0xff]  ;;  %v329_v24 = vunpack.c.l.b16 %v259_v21  ;;  %v330_v25 = vunpack.c.h.b16 %v259_v21  ;;  %v658_v27 = vld [vmem:[%s911_s25 + $0x6c] sm:$0xf0]  ;;  %v621_v33 = vld [vmem:[%s911_s25 + $0x70] sm:$0xf0]  ;;  %vm367_vm1 = vcmask 588800  }
  0x38   : > { %264 = vperm.xlu0 %720, %v260_v18   ;;  %v327_v22 = vunpack.c.l.b16 %v258_v20  ;;  %v328_v23 = vunpack.c.h.b16 %v258_v20  ;;  %v619_v26 = vld [vmem:[%s911_s25 + $0x60] sm:$0xf]  ;;  %v656_v32 = vld [vmem:[%s911_s25 + $0x64] sm:$0xf]  ;;  %v627_v34 = vld [vmem:[%s911_s25 + $0x68] sm:$0xf] }
  0x39   : > { %v349_v30 = vpack.c.b16 %v329_v24, %v329_v24  ;;  %v350_v31 = vpack.c.b16 %v330_v25, %v330_v25  ;;  %v657_v36 = vld [vmem:[%s911_s25 + $0x6c] sm:$0xf]  ;;  %v629_v37 = vld [vmem:[%s911_s25 + $0x78] sm:$0xf0]  ;;  %v620_v43 = vor.u32 %v658_v27, %v619_v26  ;;  %v624_v44 = vor.u32 %v656_v32, %v621_v33  ;;  %v603_v45 = vld [vmem:[%s911_s25 + $0x40] sm:$0xf] }
  0x3a   : > { %v347_v28 = vpack.c.b16 %v327_v22, %v327_v22  ;;  %v348_v29 = vpack.c.b16 %v328_v23, %v328_v23  ;;  %v261_v42 = vld [vmem:[%s999_s2 + $0x8] sm:$0xff]  ;;  %v654_v46 = vld [vmem:[%s911_s25 + $0x4c] sm:$0xf0]  ;;  %v628_v47 = vor.u32 %v659_v35, %v627_v34  ;;  %v632_v48 = vor.u32 %v657_v36, %v629_v37  ;;  %v652_v49 = vld [vmem:[%s911_s25 + $0x44] sm:$0xf]  ;;  %s638_s12 = sshll.u32 (%p846_p6), %s759_s14, 2 }
  0x3b   : > { %v379_v40 = vsel %vm371_vm0, %v349_v30, 0  ;;  %v382_v41 = vsel %vm371_vm0, %v350_v31, 0  ;;  %v605_v50 = vld [vmem:[%s911_s25 + $0x50] sm:$0xf0]  ;;  %v611_v51 = vld [vmem:[%s911_s25 + $0x48] sm:$0xf]  ;;  %v604_v55 = vor.u32 %v654_v46, %v603_v45 }
  0x3c   : > { %v373_v38 = vsel %vm371_vm0, %v347_v28, 0  ;;  %v376_v39 = vsel %vm371_vm0, %v348_v29, 0  ;;  %415 = vmatpush.bf16.msra.mxu2 %v379_v40  ;;  %429 = vmatpush.bf16.msra.mxu3 %v382_v41  ;;  %v655_v52 = vld [vmem:[%s911_s25 + $0x54] sm:$0xf0]  ;;  %v653_v53 = vld [vmem:[%s911_s25 + $0x4c] sm:$0xf]  ;;  %v608_v56 = vor.u32 %v652_v49, %v605_v50 }
  0x3d   : > { %387 = vmatpush.bf16.msra.mxu0 %v373_v38  ;;  %401 = vmatpush.bf16.msra.mxu1 %v376_v39  ;;  %v613_v54 = vld [vmem:[%s911_s25 + $0x58] sm:$0xf0]  ;;  %v587_v57 = vld [vmem:[%s911_s25 + $0x20] sm:$0xf]  ;;  %v650_v58 = vld [vmem:[%s911_s25 + $0x2c] sm:$0xf0]  ;;  %v612_v59 = vor.u32 %v655_v52, %v611_v51 }
  0x3e   : > { %v616_v60 = vor.u32 %v653_v53, %v613_v54  ;;  %v648_v61 = vld [vmem:[%s911_s25 + $0x24] sm:$0xf]  ;;  %v589_v62 = vld [vmem:[%s911_s25 + $0x30] sm:$0xf0]  ;;  %v595_v63 = vld [vmem:[%s911_s25 + $0x28] sm:$0xf]  ;;  %v588_v3 = vor.u32 %v650_v58, %v587_v57 }
  0x3f   : > { %v651_v0 = vld [vmem:[%s911_s25 + $0x34] sm:$0xf0]  ;;  %v649_v1 = vld [vmem:[%s911_s25 + $0x2c] sm:$0xf]  ;;  %v597_v2 = vld [vmem:[%s911_s25 + $0x38] sm:$0xf0]  ;;  %v592_v4 = vor.u32 %v648_v61, %v589_v62 }
  0x40   : > { %269 = vperm.xlu0 %720, %v261_v42   ;;  %416 = vmatpush.bf16.msra.mxu2 %v628_v47  ;;  %v571_v5 = vld [vmem:[%s911_s25] sm:$0xf]  ;;  %v646_v6 = vld [vmem:[%s911_s25 + $0xc] sm:$0xf0]  ;;  %v596_v7 = vor.u32 %v651_v0, %v595_v63  ;;  %v600_v8 = vor.u32 %v649_v1, %v597_v2  ;;  %v644_v9 = vld [vmem:[%s911_s25 + $0x4] sm:$0xf] }
  0x41   : > { %388 = vmatpush.bf16.msra.mxu0 %v620_v43  ;;  %402 = vmatpush.bf16.msra.mxu1 %v624_v44  ;;  %v573_v10 = vld [vmem:[%s911_s25 + $0x10] sm:$0xf0]  ;;  %v579_v11 = vld [vmem:[%s911_s25 + $0x8] sm:$0xf]  ;;  %v647_v12 = vld [vmem:[%s911_s25 + $0x14] sm:$0xf0]  ;;  %v572_v15 = vor.u32 %v646_v6, %v571_v5 }
  0x42   : > { %430 = vmatpush.bf16.msra.mxu3 %v632_v48  ;;  %v645_v13 = vld [vmem:[%s911_s25 + $0xc] sm:$0xf]  ;;  %v581_v14 = vld [vmem:[%s911_s25 + $0x18] sm:$0xf0]  ;;  %v576_v16 = vor.u32 %v644_v9, %v573_v10  ;;  %v580_v17 = vor.u32 %v647_v12, %v579_v11  ;;  %v643_v19 = vld [vmem:[%s998_s1] sm:$0xff]  ;;  %s639_s6 = sshll.u32 (%p846_p6), %s763_s15, 4 }
  0x43   : > { %v584_v18 = vor.u32 %v645_v13, %v581_v14  ;;  %s457_s7 = sadd.s32 (%p846_p6), %s639_s6, %s638_s12 }
  0x44   : > { %417 = vmatpush.bf16.msra.mxu2 %v612_v59  ;;  %s640_s8 = sshll.u32 (%p846_p6), %s457_s7, 2 }
  0x45   : > { %389 = vmatpush.bf16.msra.mxu0 %v604_v55  ;;  %403 = vmatpush.bf16.msra.mxu1 %v608_v56  ;;  %s459_s11 = scalar_lea.vmem (%p846_p6), %s1000_s3, %s640_s8 }
  0x46   : > { %431 = vmatpush.bf16.msra.mxu3 %v616_v60 }
  0x48   : > { %418 = vmatpush.bf16.msra.mxu2 %v596_v7 }
  0x49   : > { %390 = vmatpush.bf16.msra.mxu0 %v588_v3  ;;  %404 = vmatpush.bf16.msra.mxu1 %v592_v4 }
  0x4a   : > { %432 = vmatpush.bf16.msra.mxu3 %v600_v8 }
  0x4c   : > { %419 = vmatpush.bf16.msra.mxu2 %v580_v17 }
  0x4d   : > { %391 = vmatpush.bf16.msra.mxu0 %v572_v15  ;;  %405 = vmatpush.bf16.msra.mxu1 %v576_v16 }
  0x4e   : > { %433 = vmatpush.bf16.msra.mxu3 %v584_v18 }
  0x4f   : > { %635 = vmatmul.msk.bf16.vlgmr.msra.gmra.mxu2 %vm367_vm1, %v643_v19 }
  0x50   : > { %633 = vmatmul.msk.bf16.vlgmr.msra.gmra.mxu0 %vm367_vm1, %v643_v19  ;;  %634 = vmatmul.msk.bf16.vlgmr.msra.gmra.mxu1 %vm367_vm1, %v643_v19 }
  0x51   : > { %636 = vmatmul.msk.bf16.vlgmr.msra.gmra.mxu3 %vm367_vm1, %v643_v19 }
  0xaa   : > { %v265_v20 = vpop.permute.xlu0 %264 }
  0xb2   : > { %v270_v26 = vpop.permute.xlu0 %269 }
  0xcd   : > { %v393_v21 = vpop.f32.mrf.mxu0  ;;  %v407_v22 = vpop.f32.mrf.mxu1 }
  0xce   : > { %v394_v23 = vadd.f32 %v393_v21, %v265_v20  ;;  %v408_v24 = vadd.f32 %v407_v22, %v265_v20 }
  0xd0   : > { %v440_v25 = vpack.c.bf16 %v408_v24, %v394_v23 }
  0xd2   : > { %444 = vst [vmem:[%s959_s5] sm:$0xff] %v440_v25  ;;  %v421_v27 = vpop.f32.mrf.mxu2 }
  0xd3   : > { %v422_v29 = vadd.f32 %v421_v27, %v265_v20 }
  0xd4   : > { %v435_v28 = vpop.f32.mrf.mxu3 }
  0xd5   : > { %v436_v30 = vadd.f32 %v435_v28, %v265_v20  ;;  %v395_v31 = vpop.f32.mrf.mxu0  ;;  %v409_v32 = vpop.f32.mrf.mxu1 }
  0xd6   : > { %v396_v33 = vadd.f32 %v395_v31, %v270_v26  ;;  %v410_v34 = vadd.f32 %v409_v32, %v270_v26 }
  0xd7   : > { %v441_v35 = vpack.c.bf16 %v436_v30, %v422_v29 }
  0xd8   : > { %v442_v36 = vpack.c.bf16 %v410_v34, %v396_v33 }
  0xd9   : > { %445 = vst [vmem:[%s959_s5 + $0x8] sm:$0xff] %v441_v35  ;;  %v472_v42 = vld [vmem:[%s959_s5] sm:$0xff] (%p846_p6) }
  0xda   : > { %446 = vst [vmem:[%s959_s5 + $0x10] sm:$0xff] %v442_v36  ;;  %v423_v37 = vpop.f32.mrf.mxu2 }
  0xdb   : > { %v424_v39 = vadd.f32 %v423_v37, %v270_v26  ;;  %473 = vst [vmem:[%s459_s11] sm:$0xff] (%p846_p6), %v472_v42 }
  0xdc   : > { %v437_v38 = vpop.f32.mrf.mxu3 }
  0xdd   : > { %v438_v40 = vadd.f32 %v437_v38, %v270_v26  ;;  %454 = sbr.rel (!%p846_p6) target bundleno = 234 (0xea), region = 59 }
  0xdf   : > { %v443_v41 = vpack.c.bf16 %v438_v40, %v424_v39 }
  0xe0   : > { %v474_v43 = vld [vmem:[%s959_s5 + $0x8] sm:$0xff] (%p846_p6) }
  0xe1   : > { %447 = vst [vmem:[%s959_s5 + $0x18] sm:$0xff] %v443_v41  ;;  %v476_v44 = vld [vmem:[%s959_s5 + $0x10] sm:$0xff] (%p846_p6) }
  0xe2   : > { %475 = vst [vmem:[%s459_s11 + $0x8] sm:$0xff] %v474_v43 }
  0xe3   : > { %477 = vst [vmem:[%s459_s11 + $0x20] sm:$0xff] %v476_v44 }
  0xe8   : > { %v478_v45 = vld [vmem:[%s959_s5 + $0x18] sm:$0xff] }
  0xe9   : > { %479 = vst [vmem:[%s459_s11 + $0x28] sm:$0xff] %v478_v45 }
  0xea PF: > { %s13_s18 = sadd.s32 1, %s775_s18   ;;  %s1002_s12 = smov %s755_s13 }
  0xeb   : > { %p10_p12 = scmp.ge.s32.totalorder %s13_s18, 6   ;;  %s1003_s13 = smov %s854_s27 }
  0xec   : > { %s1004_s14 = smov %s767_s16  ;;  %s1005_s15 = smov %s771_s17 }
  0xed   : > { %s1006_s16 = smov %s1009_s19  ;;  %s1007_s17 = smov %s1013_s20 }
  0xee   :  { %12 = sbr.rel (!%p10_p12) target bundleno = 4 (0x4), region = 113 }

// kernel: upsample_block_forward.6
= control target key start
LH: loop header
LB: loop body
LE: loop exit
PB: predicated region body
PF: predicated region fallthrough
CT: control target
= control target key end

     0   :  { %s1094_s12 = smov 0   ;;  %s1096_s13 = smov 0   ;;  %s1382_s0 = inlined_call_operand.vmem [shape: bf16[2,144,1024], index: 0, kind: input, shape index: {}]   ;;  %s1383_s1 = inlined_call_operand.vmem [shape: bf16[16,144], index: 1, kind: input, shape index: {}]   ;;  %s1384_s2 = inlined_call_operand.vmem [shape: f32[16,1], index: 2, kind: input, shape index: {}]   ;;  %s1385_s3 = inlined_call_operand.vmem [shape: bf16[2,16,1024], index: 3, kind: output, shape index: {}]  }
   0x1   :  { %s1098_s14 = smov 0   ;;  %s1100_s15 = smov 0  }
   0x2   :  { %s1102_s16 = smov 0   ;;  %s1104_s17 = smov 0  }
   0x3   :  { %s1106_s18 = smov 0  }
   0x4 LB: > { %s22_s19 = sadd.s32 1, %s1063_s16  ;;  %s25_s20 = sadd.s32 1, %s1067_s17  ;;  %s1071_s18 = sphi %s1106_s18, %s13_s18   ;;  %s1067_s17 = sphi %s1104_s17, %s1392_s17   ;;  %s1063_s16 = sphi %s1102_s16, %s1391_s16   ;;  %s1059_s15 = sphi %s1100_s15, %s1390_s15   ;;  %s1055_s14 = sphi %s1098_s14, %s1389_s14   ;;  %s1051_s13 = sphi %s1096_s13, %s1388_s13   ;;  %s1047_s12 = sphi %s1094_s12, %s1387_s12  }
   0x5   : > { %p23_p0 = scmp.ge.s32.totalorder %s22_s19, 2  ;;  %s748_s21 = sadd.s32 4294967295, %s1071_s18  }
   0x6   : > { %p41_p1 = scmp.ne.s32.totalorder %s1051_s13, %s1047_s12  ;;  %p42_p2 = scmp.eq.s32.totalorder %s1071_s18, 0 }
   0x7   : > { %s1394_s19 = smov (%p23_p0, %s22_s19), 0  ;;  %s1396_s20 = smov (!%p23_p0, %s25_s20), %s1067_s17 }
   0x8   : > { %p27_p3 = scmp.ge.s32.totalorder %s1396_s20, 2  ;;  %p115_p4 = scmp.eq.s32.totalorder %s748_s21, 3 }
   0x9   : > { %s30_s22 = ssub.s32 %s1063_s16, %s1394_s19  ;;  %p43_p5 = por %p42_p2, %p41_p1 }
   0xa   : > { %s1398_s20 = smov (%p27_p3, %s1396_s20), 0  ;;  %p1142_p6 = por %p115_p4, %p41_p1 }
   0xb   : > { %s29_s24 = ssub.s32 %s1067_s17, %s1398_s20  ;;  %s34_s26 = sadd.s32 1, %s1051_s13 }
   0xc   : > { %s31_s25 = sor.u32 %s30_s22, %s29_s24  ;;  %p751_p8 = scmp.ge.s32.totalorder %s1071_s18, 4 }
   0xd   : > { %p32_p7 = scmp.eq.s32.totalorder %s31_s25, 0 }
   0xe   : > { %143 = sbr.rel (%p751_p8) target bundleno = 63 (0x3f), region = 24 }
   0xf   : > { %s1150_s27 = scalar_select %p32_p7, %s1051_s13, %s34_s26  }
  0x13   : > { %146 = sbr.rel (!%p43_p5) target bundleno = 63 (0x3f), region = 28  ;;  %s148_s28 = sand.u32 (%p43_p5), 1, %s1051_s13  }
  0x14   : > { %s956_s29 = smul.u32 (%p43_p5), 288, %s148_s28  ;;  %s752_s30 = sshll.u32 (%p43_p5), %s1063_s16, 2 }
  0x15   : > { %s957_s4 = smul.u32 (%p43_p5), 144, %s1067_s17 }
  0x16   : > { %s1164_s10 = scalar_lea.vmem (%p43_p5), [#allocation2], %s956_s29 }
  0x17   : > { %s153_s5 = sadd.s32 (%p43_p5), %s957_s4, %s752_s30 }
  0x18   : > { %s753_s6 = sshll.u32 %s153_s5, 2 }
  0x19   : > { %s1159_s9 = scalar_lea.vmem %s1382_s0, %s753_s6 }
  0x1a   : > { %v168_v0 = vld [vmem:[%s1159_s9] sm:$0xff]  ;;  %v170_v1 = vld [vmem:[%s1159_s9 + $0x8] sm:$0xff] }
  0x1b   : > { %v172_v2 = vld [vmem:[%s1159_s9 + $0x20] sm:$0xff]  ;;  %169 = vst [vmem:[%s1164_s10] sm:$0xff] %v168_v0  ;;  %v174_v3 = vld [vmem:[%s1159_s9 + $0x28] sm:$0xff] }
  0x1c   : > { %171 = vst [vmem:[%s1164_s10 + $0x8] sm:$0xff] %v170_v1  ;;  %v176_v4 = vld [vmem:[%s1159_s9 + $0x40] sm:$0xff]  ;;  %v178_v5 = vld [vmem:[%s1159_s9 + $0x48] sm:$0xff] }
  0x1d   : > { %173 = vst [vmem:[%s1164_s10 + $0x10] sm:$0xff] %v172_v2  ;;  %v180_v6 = vld [vmem:[%s1159_s9 + $0x60] sm:$0xff]  ;;  %v182_v7 = vld [vmem:[%s1159_s9 + $0x68] sm:$0xff] }
  0x1e   : > { %175 = vst [vmem:[%s1164_s10 + $0x18] sm:$0xff] %v174_v3  ;;  %v184_v8 = vld [vmem:[%s1159_s9 + $0x80] sm:$0xff]  ;;  %v186_v9 = vld [vmem:[%s1159_s9 + $0x88] sm:$0xff] }
  0x1f   : > { %177 = vst [vmem:[%s1164_s10 + $0x20] sm:$0xff] %v176_v4  ;;  %v188_v10 = vld [vmem:[%s1159_s9 + $0xa0] sm:$0xff]  ;;  %v190_v11 = vld [vmem:[%s1159_s9 + $0xa8] sm:$0xff] }
  0x20   : > { %179 = vst [vmem:[%s1164_s10 + $0x28] sm:$0xff] %v178_v5  ;;  %v192_v12 = vld [vmem:[%s1159_s9 + $0xc0] sm:$0xff]  ;;  %v194_v13 = vld [vmem:[%s1159_s9 + $0xc8] sm:$0xff] }
  0x21   : > { %181 = vst [vmem:[%s1164_s10 + $0x30] sm:$0xff] %v180_v6  ;;  %v196_v14 = vld [vmem:[%s1159_s9 + $0xe0] sm:$0xff]  ;;  %v198_v15 = vld [vmem:[%s1159_s9 + $0xe8] sm:$0xff] }
  0x22   : > { %183 = vst [vmem:[%s1164_s10 + $0x38] sm:$0xff] %v182_v7  ;;  %v200_v16 = vld [vmem:[%s1159_s9 + $0x100] sm:$0xff]  ;;  %v202_v17 = vld [vmem:[%s1159_s9 + $0x108] sm:$0xff] }
  0x23   : > { %185 = vst [vmem:[%s1164_s10 + $0x40] sm:$0xff] %v184_v8  ;;  %v204_v18 = vld [vmem:[%s1159_s9 + $0x120] sm:$0xff]  ;;  %v206_v19 = vld [vmem:[%s1159_s9 + $0x128] sm:$0xff] }
  0x24   : > { %187 = vst [vmem:[%s1164_s10 + $0x48] sm:$0xff] %v186_v9  ;;  %v208_v20 = vld [vmem:[%s1159_s9 + $0x140] sm:$0xff]  ;;  %v210_v21 = vld [vmem:[%s1159_s9 + $0x148] sm:$0xff] }
  0x25   : > { %189 = vst [vmem:[%s1164_s10 + $0x50] sm:$0xff] %v188_v10  ;;  %v212_v22 = vld [vmem:[%s1159_s9 + $0x160] sm:$0xff]  ;;  %v214_v23 = vld [vmem:[%s1159_s9 + $0x168] sm:$0xff] }
  0x26   : > { %191 = vst [vmem:[%s1164_s10 + $0x58] sm:$0xff] %v190_v11  ;;  %v216_v24 = vld [vmem:[%s1159_s9 + $0x180] sm:$0xff]  ;;  %v218_v25 = vld [vmem:[%s1159_s9 + $0x188] sm:$0xff] }
  0x27   : > { %193 = vst [vmem:[%s1164_s10 + $0x60] sm:$0xff] %v192_v12  ;;  %v220_v26 = vld [vmem:[%s1159_s9 + $0x1a0] sm:$0xff]  ;;  %v222_v27 = vld [vmem:[%s1159_s9 + $0x1a8] sm:$0xff] }
  0x28   : > { %195 = vst [vmem:[%s1164_s10 + $0x68] sm:$0xff] %v194_v13  ;;  %v224_v28 = vld [vmem:[%s1159_s9 + $0x1c0] sm:$0xff]  ;;  %v226_v29 = vld [vmem:[%s1159_s9 + $0x1c8] sm:$0xff] }
  0x29   : > { %197 = vst [vmem:[%s1164_s10 + $0x70] sm:$0xff] %v196_v14  ;;  %v228_v30 = vld [vmem:[%s1159_s9 + $0x1e0] sm:$0xff]  ;;  %v230_v31 = vld [vmem:[%s1159_s9 + $0x1e8] sm:$0xff] }
  0x2a   : > { %199 = vst [vmem:[%s1164_s10 + $0x78] sm:$0xff] %v198_v15  ;;  %v232_v32 = vld [vmem:[%s1159_s9 + $0x200] sm:$0xff]  ;;  %v234_v33 = vld [vmem:[%s1159_s9 + $0x208] sm:$0xff] }
  0x2b   : > { %201 = vst [vmem:[%s1164_s10 + $0x80] sm:$0xff] %v200_v16  ;;  %v236_v34 = vld [vmem:[%s1159_s9 + $0x220] sm:$0xff]  ;;  %v238_v35 = vld [vmem:[%s1159_s9 + $0x228] sm:$0xff] }
  0x2c   : > { %203 = vst [vmem:[%s1164_s10 + $0x88] sm:$0xff] %v202_v17 }
  0x2d   : > { %205 = vst [vmem:[%s1164_s10 + $0x90] sm:$0xff] %v204_v18 }
  0x2e   : > { %207 = vst [vmem:[%s1164_s10 + $0x98] sm:$0xff] %v206_v19 }
  0x2f   : > { %209 = vst [vmem:[%s1164_s10 + $0xa0] sm:$0xff] %v208_v20 }
  0x30   : > { %211 = vst [vmem:[%s1164_s10 + $0xa8] sm:$0xff] %v210_v21 }
  0x31   : > { %213 = vst [vmem:[%s1164_s10 + $0xb0] sm:$0xff] %v212_v22 }
  0x32   : > { %215 = vst [vmem:[%s1164_s10 + $0xb8] sm:$0xff] %v214_v23 }
  0x33   : > { %217 = vst [vmem:[%s1164_s10 + $0xc0] sm:$0xff] %v216_v24 }
  0x34   : > { %219 = vst [vmem:[%s1164_s10 + $0xc8] sm:$0xff] %v218_v25 }
  0x35   : > { %221 = vst [vmem:[%s1164_s10 + $0xd0] sm:$0xff] %v220_v26 }
  0x36   : > { %223 = vst [vmem:[%s1164_s10 + $0xd8] sm:$0xff] %v222_v27 }
  0x37   : > { %225 = vst [vmem:[%s1164_s10 + $0xe0] sm:$0xff] %v224_v28 }
  0x38   : > { %227 = vst [vmem:[%s1164_s10 + $0xe8] sm:$0xff] %v226_v29 }
  0x39   : > { %229 = vst [vmem:[%s1164_s10 + $0xf0] sm:$0xff] %v228_v30 }
  0x3a   : > { %231 = vst [vmem:[%s1164_s10 + $0xf8] sm:$0xff] %v230_v31 }
  0x3b   : > { %233 = vst [vmem:[%s1164_s10 + $0x100] sm:$0xff] %v232_v32 }
  0x3c   : > { %235 = vst [vmem:[%s1164_s10 + $0x108] sm:$0xff] %v234_v33 }
  0x3d   : > { %237 = vst [vmem:[%s1164_s10 + $0x110] sm:$0xff] %v236_v34 }
  0x3e   : > { %239 = vst [vmem:[%s1164_s10 + $0x118] sm:$0xff] %v238_v35 }
  0x3f PF: > { %p754_p9 = scmp.ge.s32.totalorder %s1071_s18, 1  ;;  %p244_p10 = scmp.lt.s32.totalorder %s1071_s18, 5 }
  0x41   : > { %p245_p11 = pnand %p754_p9, %p244_p10 }
  0x42   : > { %s251_s11 = sand.u32 (!%p245_p11), 1, %s1047_s12  }
  0x43   : > { %248 = sbr.rel (%p245_p11) target bundleno = 278 (0x116), region = 51  ;;  %s755_s10 = sshll.u32 (!%p245_p11), %s251_s11, 5 }
  0x44   : > { %s958_s21 = smul.u32 (!%p245_p11), 288, %s251_s11 }
  0x46   : > { %s1246_s28 = scalar_lea.vmem (!%p245_p11), [#allocation2], %s958_s21  ;;  %s1344_s21 = scalar_lea.vmem (!%p245_p11), [#allocation3], %s755_s10 }
  0x48   : > { %v918_v36 = vld [vmem:[%s1383_s1 + $0x4] sm:$0xf]  ;;  %v760_v37 = vld [vmem:[%s1383_s1 + $0x8] sm:$0xf0]  ;;  %vm515_vm0 = vcmask 130048   ;;  %s913_s12 = sshll.u32 (%p1142_p6), %s1055_s14, 2 }
  0x49   : > { %v878_v38 = vld [vmem:[%s1246_s28 + $0xe0] sm:$0xf]  ;;  %v950_v39 = vld [vmem:[%s1246_s28 + $0xec] sm:$0xf0]  ;;  %v948_v43 = vld [vmem:[%s1246_s28 + $0xe4] sm:$0xf]  ;;  %v1260_v54 = vor.u32 %v918_v36, %v760_v37 }
  0x4a   : > { %v894_v40 = vld [vmem:[%s1246_s28 + $0x100] sm:$0xf]  ;;  %v879_v41 = vor.u32 %v950_v39, %v878_v38  ;;  %v954_v42 = vld [vmem:[%s1246_s28 + $0x10c] sm:$0xf0]  ;;  %v880_v44 = vld [vmem:[%s1246_s28 + $0xf0] sm:$0xf0] }
  0x4b   : > { %v895_v45 = vor.u32 %v954_v42, %v894_v40  ;;  %v883_v46 = vor.u32 %v948_v43, %v880_v44  ;;  %v886_v47 = vld [vmem:[%s1246_s28 + $0xe8] sm:$0xf]  ;;  %v951_v48 = vld [vmem:[%s1246_s28 + $0xf4] sm:$0xf0]  ;;  %v862_v49 = vld [vmem:[%s1246_s28 + $0xc0] sm:$0xf] }
  0x4c   : > { %519 = vmatpush.bf16.msra.mxu0 %v879_v41  ;;  %v887_v50 = vor.u32 %v951_v48, %v886_v47  ;;  %v946_v51 = vld [vmem:[%s1246_s28 + $0xcc] sm:$0xf0]  ;;  %v944_v52 = vld [vmem:[%s1246_s28 + $0xc4] sm:$0xf]  ;;  %v864_v53 = vld [vmem:[%s1246_s28 + $0xd0] sm:$0xf0] }
  0x4d   : > { %540 = vmatpush.bf16.msra.mxu1 %v895_v45  ;;  %547 = vmatpush.bf16.msra.mxu2 %v883_v46  ;;  %v863_v55 = vor.u32 %v946_v51, %v862_v49  ;;  %v867_v56 = vor.u32 %v944_v52, %v864_v53  ;;  %v870_v57 = vld [vmem:[%s1246_s28 + $0xc8] sm:$0xf]  ;;  %v947_v58 = vld [vmem:[%s1246_s28 + $0xd4] sm:$0xf0]  ;;  %v949_v62 = vld [vmem:[%s1246_s28 + $0xec] sm:$0xf] }
  0x4e   : > { %v902_v59 = vld [vmem:[%s1246_s28 + $0x108] sm:$0xf]  ;;  %v871_v60 = vor.u32 %v947_v58, %v870_v57  ;;  %v955_v61 = vld [vmem:[%s1246_s28 + $0x114] sm:$0xf0]  ;;  %v888_v63 = vld [vmem:[%s1246_s28 + $0xf8] sm:$0xf0] }
  0x4f   : > { %v903_v0 = vor.u32 %v955_v61, %v902_v59  ;;  %v891_v1 = vor.u32 %v949_v62, %v888_v63  ;;  %v846_v2 = vld [vmem:[%s1246_s28 + $0xa0] sm:$0xf]  ;;  %v942_v3 = vld [vmem:[%s1246_s28 + $0xac] sm:$0xf0]  ;;  %v940_v4 = vld [vmem:[%s1246_s28 + $0xa4] sm:$0xf] }
  0x50   : > { %520 = vmatpush.bf16.msra.mxu0 %v863_v55  ;;  %v847_v5 = vor.u32 %v942_v3, %v846_v2  ;;  %v848_v6 = vld [vmem:[%s1246_s28 + $0xb0] sm:$0xf0]  ;;  %v854_v7 = vld [vmem:[%s1246_s28 + $0xa8] sm:$0xf]  ;;  %v943_v8 = vld [vmem:[%s1246_s28 + $0xb4] sm:$0xf0]  ;;  %908 = vmatmul.msk.bf16.vlgmr.msra.gmra.mxu1 %vm515_vm0, %v1260_v54 }
  0x51   : > { %575 = vmatpush.bf16.msrb.mxu1 %v887_v50  ;;  %548 = vmatpush.bf16.msra.mxu2 %v867_v56  ;;  %v851_v9 = vor.u32 %v940_v4, %v848_v6  ;;  %v945_v10 = vld [vmem:[%s1246_s28 + $0xcc] sm:$0xf]  ;;  %v872_v11 = vld [vmem:[%s1246_s28 + $0xd8] sm:$0xf0]  ;;  %v830_v12 = vld [vmem:[%s1246_s28 + $0x80] sm:$0xf]  ;;  %v855_v13 = vor.u32 %v943_v8, %v854_v7 }
  0x52   : > { %596 = vmatpush.bf16.msra.mxu3 %v903_v0  ;;  %v875_v14 = vor.u32 %v945_v10, %v872_v11  ;;  %v938_v15 = vld [vmem:[%s1246_s28 + $0x8c] sm:$0xf0]  ;;  %v936_v16 = vld [vmem:[%s1246_s28 + $0x84] sm:$0xf]  ;;  %v832_v17 = vld [vmem:[%s1246_s28 + $0x90] sm:$0xf0] }
  0x53   : > { %v838_v18 = vld [vmem:[%s1246_s28 + $0x88] sm:$0xf]  ;;  %v939_v19 = vld [vmem:[%s1246_s28 + $0x94] sm:$0xf0]  ;;  %v941_v20 = vld [vmem:[%s1246_s28 + $0xac] sm:$0xf]  ;;  %v831_v21 = vor.u32 %v938_v15, %v830_v12  ;;  %v835_v23 = vor.u32 %v936_v16, %v832_v17 }
  0x54   : > { %521 = vmatpush.bf16.msra.mxu0 %v847_v5  ;;  %v856_v22 = vld [vmem:[%s1246_s28 + $0xb8] sm:$0xf0]  ;;  %v814_v24 = vld [vmem:[%s1246_s28 + $0x60] sm:$0xf]  ;;  %v934_v25 = vld [vmem:[%s1246_s28 + $0x6c] sm:$0xf0]  ;;  %v839_v26 = vor.u32 %v939_v19, %v838_v18 }
  0x55   : > { %576 = vmatpush.bf16.msrb.mxu1 %v871_v60  ;;  %910 = vmatmul.msk.bf16.vlgmr.msra.gmra.mxu3 %vm515_vm0, %v1260_v54  ;;  %v859_v27 = vor.u32 %v941_v20, %v856_v22  ;;  %v932_v28 = vld [vmem:[%s1246_s28 + $0x64] sm:$0xf]  ;;  %v816_v29 = vld [vmem:[%s1246_s28 + $0x70] sm:$0xf0]  ;;  %v822_v30 = vld [vmem:[%s1246_s28 + $0x68] sm:$0xf]  ;;  %v815_v34 = vor.u32 %v934_v25, %v814_v24 }
  0x56   : > { %603 = vmatpush.bf16.msrb.mxu3 %v891_v1  ;;  %549 = vmatpush.bf16.msra.mxu2 %v851_v9  ;;  %v935_v31 = vld [vmem:[%s1246_s28 + $0x74] sm:$0xf0]  ;;  %v937_v32 = vld [vmem:[%s1246_s28 + $0x8c] sm:$0xf]  ;;  %v840_v33 = vld [vmem:[%s1246_s28 + $0x98] sm:$0xf0]  ;;  %v819_v35 = vor.u32 %v932_v28, %v816_v29 }
  0x57   : > { %v798_v36 = vld [vmem:[%s1246_s28 + $0x40] sm:$0xf]  ;;  %v930_v37 = vld [vmem:[%s1246_s28 + $0x4c] sm:$0xf0]  ;;  %v823_v38 = vor.u32 %v935_v31, %v822_v30  ;;  %v843_v39 = vor.u32 %v937_v32, %v840_v33  ;;  %v928_v40 = vld [vmem:[%s1246_s28 + $0x44] sm:$0xf] }
  0x58   : > { %522 = vmatpush.bf16.msra.mxu0 %v831_v21  ;;  %v800_v41 = vld [vmem:[%s1246_s28 + $0x50] sm:$0xf0]  ;;  %v806_v42 = vld [vmem:[%s1246_s28 + $0x48] sm:$0xf]  ;;  %v931_v43 = vld [vmem:[%s1246_s28 + $0x54] sm:$0xf0]  ;;  %v799_v46 = vor.u32 %v930_v37, %v798_v36 }
  0x59   : > { %577 = vmatpush.bf16.msrb.mxu1 %v855_v13  ;;  %v933_v44 = vld [vmem:[%s1246_s28 + $0x6c] sm:$0xf]  ;;  %v824_v45 = vld [vmem:[%s1246_s28 + $0x78] sm:$0xf0]  ;;  %v803_v47 = vor.u32 %v928_v40, %v800_v41  ;;  %v782_v48 = vld [vmem:[%s1246_s28 + $0x20] sm:$0xf]  ;;  %v807_v50 = vor.u32 %v931_v43, %v806_v42 }
  0x5a   : > { %604 = vmatpush.bf16.msrb.mxu3 %v875_v14  ;;  %550 = vmatpush.bf16.msra.mxu2 %v835_v23  ;;  %v926_v49 = vld [vmem:[%s1246_s28 + $0x2c] sm:$0xf0]  ;;  %v827_v51 = vor.u32 %v933_v44, %v824_v45  ;;  %v924_v52 = vld [vmem:[%s1246_s28 + $0x24] sm:$0xf]  ;;  %v784_v53 = vld [vmem:[%s1246_s28 + $0x30] sm:$0xf0] }
  0x5b   : > { %v790_v55 = vld [vmem:[%s1246_s28 + $0x28] sm:$0xf]  ;;  %v927_v56 = vld [vmem:[%s1246_s28 + $0x34] sm:$0xf0]  ;;  %v929_v57 = vld [vmem:[%s1246_s28 + $0x4c] sm:$0xf]  ;;  %v783_v59 = vor.u32 %v926_v49, %v782_v48  ;;  %v787_v63 = vor.u32 %v924_v52, %v784_v53 }
  0x5c   : > { %523 = vmatpush.bf16.msra.mxu0 %v815_v34  ;;  %v808_v58 = vld [vmem:[%s1246_s28 + $0x58] sm:$0xf0]  ;;  %v766_v60 = vld [vmem:[%s1246_s28] sm:$0xf]  ;;  %v922_v61 = vld [vmem:[%s1246_s28 + $0xc] sm:$0xf0]  ;;  %v791_v3 = vor.u32 %v927_v56, %v790_v55 }
  0x5d   : > { %578 = vmatpush.bf16.msrb.mxu1 %v839_v26  ;;  %v920_v62 = vld [vmem:[%s1246_s28 + $0x4] sm:$0xf]  ;;  %v768_v0 = vld [vmem:[%s1246_s28 + $0x10] sm:$0xf0]  ;;  %v774_v1 = vld [vmem:[%s1246_s28 + $0x8] sm:$0xf]  ;;  %v811_v4 = vor.u32 %v929_v57, %v808_v58  ;;  %v767_v12 = vor.u32 %v922_v61, %v766_v60 }
  0x5e   : > { %605 = vmatpush.bf16.msrb.mxu3 %v859_v27  ;;  %551 = vmatpush.bf16.msra.mxu2 %v819_v35  ;;  %v314_v2 = vld [vmem:[%s1384_s2] sm:$0xff]  ;;  %v923_v5 = vld [vmem:[%s1246_s28 + $0x14] sm:$0xf0]  ;;  %v953_v6 = vld [vmem:[%s1246_s28 + $0x10c] sm:$0xf]  ;;  %v1073_v11 = vmov 0   ;;  %v771_v16 = vor.u32 %v920_v62, %v768_v0 }
  0x5f   : > { %v904_v7 = vld [vmem:[%s1246_s28 + $0x118] sm:$0xf0]  ;;  %v925_v8 = vld [vmem:[%s1246_s28 + $0x2c] sm:$0xf]  ;;  %v758_v10 = vld [vmem:[%s1383_s1] sm:$0xf]  ;;  %1016 = vset.pattern.permute.xlu0 %v1073_v11  ;;  %v775_v18 = vor.u32 %v923_v5, %v774_v1 }
  0x60   : > { %524 = vmatpush.bf16.msra.mxu0 %v799_v46  ;;  %v792_v9 = vld [vmem:[%s1246_s28 + $0x38] sm:$0xf0]  ;;  %v919_v13 = vld [vmem:[%s1383_s1 + $0x4] sm:$0xf0]  ;;  %v952_v14 = vld [vmem:[%s1246_s28 + $0x104] sm:$0xf]  ;;  %318 = vperm.xlu0 %1016, %v314_v2   ;;  %v907_v17 = vor.u32 %v953_v6, %v904_v7 }
  0x61   : > { %579 = vmatpush.bf16.msrb.mxu1 %v823_v38  ;;  %v896_v15 = vld [vmem:[%s1246_s28 + $0x110] sm:$0xf0]  ;;  %v795_v19 = vor.u32 %v925_v8, %v792_v9  ;;  %v759_v20 = vor.u32 %v919_v13, %v758_v10  ;;  %v921_v22 = vld [vmem:[%s1246_s28 + $0xc] sm:$0xf]  ;;  %v776_v23 = vld [vmem:[%s1246_s28 + $0x18] sm:$0xf0] }
  0x62   : > { %606 = vmatpush.bf16.msrb.mxu3 %v843_v39  ;;  %552 = vmatpush.bf16.msra.mxu2 %v803_v47  ;;  %v899_v21 = vor.u32 %v952_v14, %v896_v15  ;;  %v315_v24 = vld [vmem:[%s1384_s2 + $0x8] sm:$0xff]  ;;  %v779_v25 = vor.u32 %v921_v22, %v776_v23  ;;  %s914_s11 = sshll.u32 (%p1142_p6), %s1059_s15, 4 }
  0x63   : > { %s648_s22 = sadd.s32 (%p1142_p6), %s914_s11, %s913_s12 }
  0x64   : > { %525 = vmatpush.bf16.msra.mxu0 %v783_v59  ;;  %s915_s24 = sshll.u32 (%p1142_p6), %s648_s22, 2 }
  0x65   : > { %580 = vmatpush.bf16.msrb.mxu1 %v807_v50  ;;  %s650_s28 = scalar_lea.vmem (%p1142_p6), %s1385_s3, %s915_s24 }
  0x66   : > { %607 = vmatpush.bf16.msrb.mxu3 %v827_v51  ;;  %553 = vmatpush.bf16.msra.mxu2 %v787_v63 }
  0x68   : > { %526 = vmatpush.bf16.msra.mxu0 %v767_v12  ;;  %323 = vperm.xlu0 %1016, %v315_v24  }
  0x69   : > { %581 = vmatpush.bf16.msrb.mxu1 %v791_v3 }
  0x6a   : > { %608 = vmatpush.bf16.msrb.mxu3 %v811_v4  ;;  %554 = vmatpush.bf16.msra.mxu2 %v771_v16 }
  0x6b   : > { %527 = vmatmul.bf16.vlgmr.msra.gmra.mxu0 %v759_v20 }
  0x6c   : > { %624 = vmatpush.bf16.msrb.mxu0 %v907_v17 }
  0x6d   : > { %582 = vmatpush.bf16.msrb.mxu1 %v775_v18  ;;  %555 = vmatmul.bf16.vlgmr.msra.gmra.mxu2 %v759_v20 }
  0x6e   : > { %609 = vmatpush.bf16.msrb.mxu3 %v795_v19  ;;  %568 = vmatpush.bf16.msrb.mxu2 %v899_v21 }
  0x70   : > { %583 = vmatmul.bf16.vlgmr.msrb.gmra.mxu1 %v759_v20 }
  0x72   : > { %610 = vmatpush.bf16.msrb.mxu3 %v779_v25 }
  0x75   : > { %611 = vmatmul.bf16.vlgmr.msrb.gmra.mxu3 %v759_v20 }
  0x7b   : > { %911 = vmatmul.msk.bf16.vlgmr.msrb.gmra.mxu0 %vm515_vm0, %v1260_v54 }
  0x7d   : > { %909 = vmatmul.msk.bf16.vlgmr.msrb.gmra.mxu2 %vm515_vm0, %v1260_v54 }
  0xcd   : > { %v542_v26 = vpop.f32.mrf.mxu1 }
  0xd2   : > { %v319_v31 = vpop.permute.xlu0 %318 }
  0xd5   : > { %v544_v28 = vpop.f32.mrf.mxu1 }
  0xd8   : > { %v598_v27 = vpop.f32.mrf.mxu3 }
  0xda   : > { %v324_v42 = vpop.permute.xlu0 %323 }
  0xe0   : > { %v600_v30 = vpop.f32.mrf.mxu3 }
  0xe8   : > { %v528_v29 = vpop.f32.mrf.mxu0 }
  0xe9   : > { %v529_v44 = vadd.f32 %v528_v29, %v319_v31 }
  0xeb   : > { %v543_v50 = vadd.f32 %v542_v26, %v529_v44 }
  0xed   : > { %v584_v33 = vpop.f32.mrf.mxu1 }
  0xee   : > { %v585_v36 = vadd.f32 %v584_v33, %v319_v31 }
  0xf0   : > { %v556_v32 = vpop.f32.mrf.mxu2  ;;  %v530_v34 = vpop.f32.mrf.mxu0  ;;  %v599_v40 = vadd.f32 %v598_v27, %v585_v36 }
  0xf1   : > { %v557_v47 = vadd.f32 %v556_v32, %v319_v31  ;;  %v531_v58 = vadd.f32 %v530_v34, %v324_v42 }
  0xf3   : > { %v545_v61 = vadd.f32 %v544_v28, %v531_v58 }
  0xf5   : > { %v586_v54 = vpop.f32.mrf.mxu1 }
  0xf6   : > { %v587_v46 = vadd.f32 %v586_v54, %v324_v42 }
  0xf8   : > { %v612_v35 = vpop.f32.mrf.mxu3  ;;  %v558_v38 = vpop.f32.mrf.mxu2  ;;  %v601_v53 = vadd.f32 %v600_v30, %v587_v46 }
  0xf9   : > { %v613_v37 = vadd.f32 %v612_v35, %v319_v31  ;;  %v626_v39 = vpop.f32.mrf.mxu0  ;;  %v559_v59 = vadd.f32 %v558_v38, %v324_v42 }
  0xfb   : > { %v627_v41 = vadd.f32 %v626_v39, %v613_v37 }
  0xfd   : > { %v632_v43 = vpack.c.bf16 %v627_v41, %v599_v40 }
  0xff   : > { %636 = vst [vmem:[%s1344_s21 + $0x8] sm:$0xff] %v632_v43 }
 0x100   : > { %v614_v45 = vpop.f32.mrf.mxu3  ;;  %v570_v49 = vpop.f32.mrf.mxu2 }
 0x101   : > { %v615_v48 = vadd.f32 %v614_v45, %v324_v42  ;;  %v571_v51 = vadd.f32 %v570_v49, %v557_v47  ;;  %v628_v52 = vpop.f32.mrf.mxu0 }
 0x103   : > { %v629_v55 = vadd.f32 %v628_v52, %v615_v48  ;;  %v631_v56 = vpack.c.bf16 %v571_v51, %v543_v50 }
 0x105   : > { %v634_v57 = vpack.c.bf16 %v629_v55, %v601_v53  ;;  %635 = vst [vmem:[%s1344_s21] sm:$0xff] %v631_v56 }
 0x106   : > { %v665_v1 = vld [vmem:[%s1344_s21 + $0x8] sm:$0xff] (%p1142_p6) }
 0x107   : > { %638 = vst [vmem:[%s1344_s21 + $0x18] sm:$0xff] %v634_v57 }
 0x108   : > { %v572_v60 = vpop.f32.mrf.mxu2  ;;  %666 = vst [vmem:[%s650_s28 + $0x8] sm:$0xff] (%p1142_p6), %v665_v1 }
 0x109   : > { %v573_v62 = vadd.f32 %v572_v60, %v559_v59  ;;  %645 = sbr.rel (!%p1142_p6) target bundleno = 278 (0x116), region = 59 }
 0x10b   : > { %v633_v63 = vpack.c.bf16 %v573_v62, %v545_v61 }
 0x10c   : > { %v663_v0 = vld [vmem:[%s1344_s21] sm:$0xff] (%p1142_p6) }
 0x10d   : > { %637 = vst [vmem:[%s1344_s21 + $0x10] sm:$0xff] %v633_v63 }
 0x10e   : > { %664 = vst [vmem:[%s650_s28] sm:$0xff] %v663_v0  ;;  %v669_v3 = vld [vmem:[%s1344_s21 + $0x18] sm:$0xff] }
 0x10f   : > { %670 = vst [vmem:[%s650_s28 + $0x28] sm:$0xff] %v669_v3 }
 0x114   : > { %v667_v2 = vld [vmem:[%s1344_s21 + $0x10] sm:$0xff] }
 0x115   : > { %668 = vst [vmem:[%s650_s28 + $0x20] sm:$0xff] %v667_v2 }
 0x116 PF: > { %s13_s18 = sadd.s32 1, %s1071_s18   ;;  %s1387_s12 = smov %s1051_s13 }
 0x117   : > { %p10_p12 = scmp.ge.s32.totalorder %s13_s18, 6   ;;  %s1388_s13 = smov %s1150_s27 }
 0x118   : > { %s1389_s14 = smov %s1063_s16  ;;  %s1390_s15 = smov %s1067_s17 }
 0x119   : > { %s1391_s16 = smov %s1394_s19  ;;  %s1392_s17 = smov %s1398_s20 }
 0x11a   :  { %12 = sbr.rel (!%p10_p12) target bundleno = 4 (0x4), region = 113 }

// kernel: upsample_block_forward.7
= control target key start
LH: loop header
LB: loop body
LE: loop exit
PB: predicated region body
PF: predicated region fallthrough
CT: control target
= control target key end

     0   :  { %s935_s15 = smov 0   ;;  %s937_s16 = smov 0   ;;  %s1163_s0 = inlined_call_operand.vmem [shape: bf16[2,72,1024], index: 0, kind: input, shape index: {}]   ;;  %s1164_s1 = inlined_call_operand.vmem [shape: bf16[16,72], index: 1, kind: input, shape index: {}]   ;;  %s1165_s2 = inlined_call_operand.vmem [shape: f32[16,1], index: 2, kind: input, shape index: {}]   ;;  %s1166_s3 = inlined_call_operand.vmem [shape: bf16[2,16,1024], index: 3, kind: input, shape index: {}]   ;;  %s1167_s4 = inlined_call_operand.vmem [shape: f32[2,16,1024], index: 4, kind: output, shape index: {}]  }
   0x1   :  { %s939_s17 = smov 0   ;;  %s941_s18 = smov 0  }
   0x2   :  { %s943_s19 = smov 0   ;;  %s945_s20 = smov 0  }
   0x3   :  { %s947_s21 = smov 0  }
   0x4 LB: > { %s23_s22 = sadd.s32 1, %s899_s19  ;;  %s26_s23 = sadd.s32 1, %s903_s20  ;;  %s907_s21 = sphi %s947_s21, %s14_s21   ;;  %s903_s20 = sphi %s945_s20, %s1175_s20   ;;  %s899_s19 = sphi %s943_s19, %s1174_s19   ;;  %s895_s18 = sphi %s941_s18, %s1173_s18   ;;  %s891_s17 = sphi %s939_s17, %s1172_s17   ;;  %s887_s16 = sphi %s937_s16, %s1171_s16   ;;  %s883_s15 = sphi %s935_s15, %s1170_s15  }
   0x5   : > { %p24_p0 = scmp.ge.s32.totalorder %s23_s22, 2  ;;  %s684_s24 = sadd.s32 4294967295, %s907_s21  }
   0x6   : > { %p42_p1 = scmp.ne.s32.totalorder %s887_s16, %s883_s15  ;;  %p43_p2 = scmp.eq.s32.totalorder %s907_s21, 0 }
   0x7   : > { %s1177_s22 = smov (%p24_p0, %s23_s22), 0  ;;  %s1179_s23 = smov (!%p24_p0, %s26_s23), %s903_s20 }
   0x8   : > { %p28_p3 = scmp.ge.s32.totalorder %s1179_s23, 2  ;;  %p144_p4 = scmp.eq.s32.totalorder %s684_s24, 3 }
   0x9   : > { %s31_s25 = ssub.s32 %s899_s19, %s1177_s22  ;;  %p981_p5 = por %p43_p2, %p42_p1 }
   0xa   : > { %s1181_s23 = smov (%p28_p3, %s1179_s23), 0  ;;  %p987_p6 = por %p144_p4, %p42_p1 }
   0xb   : > { %s30_s28 = ssub.s32 %s903_s20, %s1181_s23  ;;  %s35_s30 = sadd.s32 1, %s887_s16 }
   0xc   : > { %s32_s29 = sor.u32 %s31_s25, %s30_s28  ;;  %p687_p8 = scmp.ge.s32.totalorder %s907_s21, 4 }
   0xd   : > { %p33_p7 = scmp.eq.s32.totalorder %s32_s29, 0 }
   0xe   : > { %172 = sbr.rel (%p687_p8) target bundleno = 56 (0x38), region = 24 }
   0xf   : > { %s995_s5 = scalar_select %p33_p7, %s887_s16, %s35_s30  }
  0x13   : > { %175 = sbr.rel (!%p981_p5) target bundleno = 45 (0x2d), region = 28  ;;  %s177_s6 = sand.u32 (%p981_p5), 1, %s887_s16  }
  0x14   : > { %s792_s7 = smul.u32 (%p981_p5), 144, %s177_s6  ;;  %s688_s8 = sshll.u32 (%p981_p5), %s899_s19, 2 }
  0x15   : > { %s793_s9 = smul.u32 (%p981_p5), 72, %s903_s20 }
  0x16   : > { %s1011_s24 = scalar_lea.vmem (%p981_p5), [#allocation2], %s792_s7 }
  0x17   : > { %s182_s10 = sadd.s32 (%p981_p5), %s793_s9, %s688_s8 }
  0x18   : > { %s689_s11 = sshll.u32 %s182_s10, 2 }
  0x19   : > { %s1006_s14 = scalar_lea.vmem %s1163_s0, %s689_s11 }
  0x1a   : > { %v197_v0 = vld [vmem:[%s1006_s14] sm:$0xff]  ;;  %v199_v1 = vld [vmem:[%s1006_s14 + $0x8] sm:$0xff] }
  0x1b   : > { %v201_v2 = vld [vmem:[%s1006_s14 + $0x20] sm:$0xff]  ;;  %198 = vst [vmem:[%s1011_s24] sm:$0xff] %v197_v0  ;;  %v203_v3 = vld [vmem:[%s1006_s14 + $0x28] sm:$0xff] }
  0x1c   : > { %200 = vst [vmem:[%s1011_s24 + $0x8] sm:$0xff] %v199_v1  ;;  %v205_v4 = vld [vmem:[%s1006_s14 + $0x40] sm:$0xff]  ;;  %v207_v5 = vld [vmem:[%s1006_s14 + $0x48] sm:$0xff] }
  0x1d   : > { %202 = vst [vmem:[%s1011_s24 + $0x10] sm:$0xff] %v201_v2  ;;  %v209_v6 = vld [vmem:[%s1006_s14 + $0x60] sm:$0xff]  ;;  %v211_v7 = vld [vmem:[%s1006_s14 + $0x68] sm:$0xff] }
  0x1e   : > { %204 = vst [vmem:[%s1011_s24 + $0x18] sm:$0xff] %v203_v3  ;;  %v213_v8 = vld [vmem:[%s1006_s14 + $0x80] sm:$0xff]  ;;  %v215_v9 = vld [vmem:[%s1006_s14 + $0x88] sm:$0xff] }
  0x1f   : > { %206 = vst [vmem:[%s1011_s24 + $0x20] sm:$0xff] %v205_v4  ;;  %v217_v10 = vld [vmem:[%s1006_s14 + $0xa0] sm:$0xff]  ;;  %v219_v11 = vld [vmem:[%s1006_s14 + $0xa8] sm:$0xff] }
  0x20   : > { %208 = vst [vmem:[%s1011_s24 + $0x28] sm:$0xff] %v207_v5  ;;  %v221_v12 = vld [vmem:[%s1006_s14 + $0xc0] sm:$0xff]  ;;  %v223_v13 = vld [vmem:[%s1006_s14 + $0xc8] sm:$0xff] }
  0x21   : > { %210 = vst [vmem:[%s1011_s24 + $0x30] sm:$0xff] %v209_v6  ;;  %v225_v14 = vld [vmem:[%s1006_s14 + $0xe0] sm:$0xff]  ;;  %v227_v15 = vld [vmem:[%s1006_s14 + $0xe8] sm:$0xff] }
  0x22   : > { %212 = vst [vmem:[%s1011_s24 + $0x38] sm:$0xff] %v211_v7  ;;  %v229_v16 = vld [vmem:[%s1006_s14 + $0x100] sm:$0xff]  ;;  %v231_v17 = vld [vmem:[%s1006_s14 + $0x108] sm:$0xff] }
  0x23   : > { %214 = vst [vmem:[%s1011_s24 + $0x40] sm:$0xff] %v213_v8 }
  0x24   : > { %216 = vst [vmem:[%s1011_s24 + $0x48] sm:$0xff] %v215_v9 }
  0x25   : > { %218 = vst [vmem:[%s1011_s24 + $0x50] sm:$0xff] %v217_v10 }
  0x26   : > { %220 = vst [vmem:[%s1011_s24 + $0x58] sm:$0xff] %v219_v11 }
  0x27   : > { %222 = vst [vmem:[%s1011_s24 + $0x60] sm:$0xff] %v221_v12 }
  0x28   : > { %224 = vst [vmem:[%s1011_s24 + $0x68] sm:$0xff] %v223_v13 }
  0x29   : > { %226 = vst [vmem:[%s1011_s24 + $0x70] sm:$0xff] %v225_v14 }
  0x2a   : > { %228 = vst [vmem:[%s1011_s24 + $0x78] sm:$0xff] %v227_v15 }
  0x2b   : > { %230 = vst [vmem:[%s1011_s24 + $0x80] sm:$0xff] %v229_v16 }
  0x2c   : > { %232 = vst [vmem:[%s1011_s24 + $0x88] sm:$0xff] %v231_v17 }
  0x2d PF: > { %238 = sbr.rel (!%p981_p5) target bundleno = 56 (0x38), region = 51  ;;  %s240_s25 = sand.u32 (%p981_p5), 1, %s887_s16  }
  0x2e   : > { %s691_s28 = sshll.u32 (%p981_p5), %s899_s19, 2  ;;  %s690_s29 = sshll.u32 (%p981_p5), %s240_s25, 5 }
  0x2f   : > { %s692_s30 = sshll.u32 (%p981_p5), %s903_s20, 4  ;;  %s242_s11 = scalar_lea.vmem (%p981_p5), [#allocation3], %s690_s29 }
  0x30   : > { %s245_s6 = sadd.s32 (%p981_p5), %s692_s30, %s691_s28 }
  0x31   : > { %s693_s7 = sshll.u32 (%p981_p5), %s245_s6, 2 }
  0x32   : > { %s247_s10 = scalar_lea.vmem %s1166_s3, %s693_s7 }
  0x33   : > { %v260_v18 = vld [vmem:[%s247_s10] sm:$0xff]  ;;  %v262_v19 = vld [vmem:[%s247_s10 + $0x8] sm:$0xff] }
  0x34   : > { %v264_v20 = vld [vmem:[%s247_s10 + $0x20] sm:$0xff]  ;;  %261 = vst [vmem:[%s242_s11] sm:$0xff] %v260_v18  ;;  %v266_v21 = vld [vmem:[%s247_s10 + $0x28] sm:$0xff] }
  0x35   : > { %263 = vst [vmem:[%s242_s11 + $0x8] sm:$0xff] %v262_v19 }
  0x36   : > { %265 = vst [vmem:[%s242_s11 + $0x10] sm:$0xff] %v264_v20 }
  0x37   : > { %267 = vst [vmem:[%s242_s11 + $0x18] sm:$0xff] %v266_v21 }
  0x38 PF: > { %p694_p9 = scmp.ge.s32.totalorder %s907_s21, 1  ;;  %p272_p10 = scmp.lt.s32.totalorder %s907_s21, 5 }
  0x3a   : > { %p273_p11 = pnand %p694_p9, %p272_p10 }
  0x3b   : > { %s1057_s26 = sand.u32 (!%p273_p11), 1, %s883_s15  }
  0x3c   : > { %276 = sbr.rel (%p273_p11) target bundleno = 245 (0xf5), region = 74  ;;  %s695_s30 = sshll.u32 (!%p273_p11), %s1057_s26, 5 }
  0x3d   : > { %s794_s14 = smul.u32 (!%p273_p11), 144, %s1057_s26  ;;  %s1110_s6 = scalar_lea.vmem (!%p273_p11), [#allocation3], %s695_s30 }
  0x3e   : > { %s696_s7 = sshll.u32 (!%p273_p11), %s1057_s26, 6 }
  0x3f   : > { %s1063_s24 = scalar_lea.vmem (!%p273_p11), [#allocation2], %s794_s14  ;;  %s1116_s8 = scalar_lea.vmem (!%p273_p11), [#allocation4], %s696_s7 }
  0x41   : > { %v338_v22 = vld [vmem:[%s1165_s2] sm:$0xff]  ;;  %v909_v23 = vmov 0   ;;  %v337_v25 = vld [vmem:[%s1063_s24 + $0x88] sm:$0xff]  ;;  %vm449_vm0 = vcmask 1043456   ;;  %v791_v39 = vld [vmem:[%s1063_s24 + $0x74] sm:$0xf0] }
  0x42   : > { %852 = vset.pattern.permute.xlu0 %v909_v23  ;;  %v336_v24 = vld [vmem:[%s1063_s24 + $0x80] sm:$0xff]  ;;  %v407_v28 = vunpack.c.l.b16 %v337_v25  ;;  %v408_v29 = vunpack.c.h.b16 %v337_v25  ;;  %v790_v31 = vld [vmem:[%s1063_s24 + $0x6c] sm:$0xf0]  ;;  %v753_v37 = vld [vmem:[%s1063_s24 + $0x70] sm:$0xf0]  ;;  %vm445_vm1 = vcmask 588800  }
  0x43   : > { %342 = vperm.xlu0 %852, %v338_v22   ;;  %v405_v26 = vunpack.c.l.b16 %v336_v24  ;;  %v406_v27 = vunpack.c.h.b16 %v336_v24  ;;  %v751_v30 = vld [vmem:[%s1063_s24 + $0x60] sm:$0xf]  ;;  %v788_v36 = vld [vmem:[%s1063_s24 + $0x64] sm:$0xf]  ;;  %v759_v38 = vld [vmem:[%s1063_s24 + $0x68] sm:$0xf] }
  0x44   : > { %v427_v34 = vpack.c.b16 %v407_v28, %v407_v28  ;;  %v428_v35 = vpack.c.b16 %v408_v29, %v408_v29  ;;  %v789_v40 = vld [vmem:[%s1063_s24 + $0x6c] sm:$0xf]  ;;  %v761_v41 = vld [vmem:[%s1063_s24 + $0x78] sm:$0xf0]  ;;  %v752_v47 = vor.u32 %v790_v31, %v751_v30  ;;  %v756_v48 = vor.u32 %v788_v36, %v753_v37  ;;  %v735_v49 = vld [vmem:[%s1063_s24 + $0x40] sm:$0xf] }
  0x45   : > { %v425_v32 = vpack.c.b16 %v405_v26, %v405_v26  ;;  %v426_v33 = vpack.c.b16 %v406_v27, %v406_v27  ;;  %v339_v46 = vld [vmem:[%s1165_s2 + $0x8] sm:$0xff]  ;;  %v786_v50 = vld [vmem:[%s1063_s24 + $0x4c] sm:$0xf0]  ;;  %v760_v51 = vor.u32 %v791_v39, %v759_v38  ;;  %v764_v52 = vor.u32 %v789_v40, %v761_v41  ;;  %v784_v53 = vld [vmem:[%s1063_s24 + $0x44] sm:$0xf]  ;;  %s770_s9 = sshll.u32 (%p987_p6), %s891_s17, 2 }
  0x46   : > { %v457_v44 = vsel %vm449_vm0, %v427_v34, 0  ;;  %v460_v45 = vsel %vm449_vm0, %v428_v35, 0  ;;  %v737_v54 = vld [vmem:[%s1063_s24 + $0x50] sm:$0xf0]  ;;  %v743_v55 = vld [vmem:[%s1063_s24 + $0x48] sm:$0xf]  ;;  %v736_v59 = vor.u32 %v786_v50, %v735_v49 }
  0x47   : > { %v451_v42 = vsel %vm449_vm0, %v425_v32, 0  ;;  %v454_v43 = vsel %vm449_vm0, %v426_v33, 0  ;;  %493 = vmatpush.bf16.msra.mxu2 %v457_v44  ;;  %507 = vmatpush.bf16.msra.mxu3 %v460_v45  ;;  %v787_v56 = vld [vmem:[%s1063_s24 + $0x54] sm:$0xf0]  ;;  %v785_v57 = vld [vmem:[%s1063_s24 + $0x4c] sm:$0xf]  ;;  %v740_v60 = vor.u32 %v784_v53, %v737_v54 }
  0x48   : > { %465 = vmatpush.bf16.msra.mxu0 %v451_v42  ;;  %479 = vmatpush.bf16.msra.mxu1 %v454_v43  ;;  %v745_v58 = vld [vmem:[%s1063_s24 + $0x58] sm:$0xf0]  ;;  %v719_v61 = vld [vmem:[%s1063_s24 + $0x20] sm:$0xf]  ;;  %v782_v62 = vld [vmem:[%s1063_s24 + $0x2c] sm:$0xf0]  ;;  %v744_v63 = vor.u32 %v787_v56, %v743_v55 }
  0x49   : > { %v748_v0 = vor.u32 %v785_v57, %v745_v58  ;;  %v780_v1 = vld [vmem:[%s1063_s24 + $0x24] sm:$0xf]  ;;  %v721_v2 = vld [vmem:[%s1063_s24 + $0x30] sm:$0xf0]  ;;  %v727_v3 = vld [vmem:[%s1063_s24 + $0x28] sm:$0xf]  ;;  %v720_v7 = vor.u32 %v782_v62, %v719_v61 }
  0x4a   : > { %v783_v4 = vld [vmem:[%s1063_s24 + $0x34] sm:$0xf0]  ;;  %v781_v5 = vld [vmem:[%s1063_s24 + $0x2c] sm:$0xf]  ;;  %v729_v6 = vld [vmem:[%s1063_s24 + $0x38] sm:$0xf0]  ;;  %v724_v8 = vor.u32 %v780_v1, %v721_v2 }
  0x4b   : > { %347 = vperm.xlu0 %852, %v339_v46   ;;  %494 = vmatpush.bf16.msra.mxu2 %v760_v51  ;;  %v703_v9 = vld [vmem:[%s1063_s24] sm:$0xf]  ;;  %v778_v10 = vld [vmem:[%s1063_s24 + $0xc] sm:$0xf0]  ;;  %v728_v11 = vor.u32 %v783_v4, %v727_v3  ;;  %v732_v12 = vor.u32 %v781_v5, %v729_v6  ;;  %v776_v13 = vld [vmem:[%s1063_s24 + $0x4] sm:$0xf] }
  0x4c   : > { %466 = vmatpush.bf16.msra.mxu0 %v752_v47  ;;  %480 = vmatpush.bf16.msra.mxu1 %v756_v48  ;;  %v705_v14 = vld [vmem:[%s1063_s24 + $0x10] sm:$0xf0]  ;;  %v711_v15 = vld [vmem:[%s1063_s24 + $0x8] sm:$0xf]  ;;  %v779_v16 = vld [vmem:[%s1063_s24 + $0x14] sm:$0xf0]  ;;  %v704_v19 = vor.u32 %v778_v10, %v703_v9 }
  0x4d   : > { %508 = vmatpush.bf16.msra.mxu3 %v764_v52  ;;  %v777_v17 = vld [vmem:[%s1063_s24 + $0xc] sm:$0xf]  ;;  %v713_v18 = vld [vmem:[%s1063_s24 + $0x18] sm:$0xf0]  ;;  %v708_v20 = vor.u32 %v776_v13, %v705_v14  ;;  %v712_v21 = vor.u32 %v779_v16, %v711_v15  ;;  %v775_v23 = vld [vmem:[%s1164_s1] sm:$0xff]  ;;  %s771_s10 = sshll.u32 (%p987_p6), %s895_s18, 4 }
  0x4e   : > { %v716_v22 = vor.u32 %v777_v17, %v713_v18  ;;  %v518_v25 = vld [vmem:[%s1110_s6] sm:$0xff]  ;;  %v519_v34 = vld [vmem:[%s1110_s6 + $0x8] sm:$0xff]  ;;  %v520_v35 = vld [vmem:[%s1110_s6 + $0x10] sm:$0xff]  ;;  %s555_s11 = sadd.s32 (%p987_p6), %s771_s10, %s770_s9 }
  0x4f   : > { %495 = vmatpush.bf16.msra.mxu2 %v744_v63  ;;  %v522_v26 = vunpack.c.l.bf16 %v518_v25  ;;  %v523_v27 = vunpack.c.h.bf16 %v518_v25  ;;  %v524_v37 = vunpack.c.l.bf16 %v519_v34  ;;  %v525_v38 = vunpack.c.h.bf16 %v519_v34  ;;  %v521_v53 = vld [vmem:[%s1110_s6 + $0x18] sm:$0xff]  ;;  %s772_s26 = sshll.u32 (%p987_p6), %s555_s11, 3 }
  0x50   : > { %467 = vmatpush.bf16.msra.mxu0 %v736_v59  ;;  %481 = vmatpush.bf16.msra.mxu1 %v740_v60  ;;  %v526_v41 = vunpack.c.l.bf16 %v520_v35  ;;  %v527_v42 = vunpack.c.h.bf16 %v520_v35  ;;  %v528_v54 = vunpack.c.l.bf16 %v521_v53  ;;  %v529_v55 = vunpack.c.h.bf16 %v521_v53  ;;  %s557_s27 = scalar_lea.vmem (%p987_p6), %s1167_s4, %s772_s26 }
  0x51   : > { %509 = vmatpush.bf16.msra.mxu3 %v748_v0 }
  0x53   : > { %496 = vmatpush.bf16.msra.mxu2 %v728_v11 }
  0x54   : > { %468 = vmatpush.bf16.msra.mxu0 %v720_v7  ;;  %482 = vmatpush.bf16.msra.mxu1 %v724_v8 }
  0x55   : > { %510 = vmatpush.bf16.msra.mxu3 %v732_v12 }
  0x57   : > { %497 = vmatpush.bf16.msra.mxu2 %v712_v21 }
  0x58   : > { %469 = vmatpush.bf16.msra.mxu0 %v704_v19  ;;  %483 = vmatpush.bf16.msra.mxu1 %v708_v20 }
  0x59   : > { %511 = vmatpush.bf16.msra.mxu3 %v716_v22 }
  0x5a   : > { %767 = vmatmul.msk.bf16.vlgmr.msra.gmra.mxu2 %vm445_vm1, %v775_v23 }
  0x5b   : > { %765 = vmatmul.msk.bf16.vlgmr.msra.gmra.mxu0 %vm445_vm1, %v775_v23  ;;  %766 = vmatmul.msk.bf16.vlgmr.msra.gmra.mxu1 %vm445_vm1, %v775_v23 }
  0x5c   : > { %768 = vmatmul.msk.bf16.vlgmr.msra.gmra.mxu3 %vm445_vm1, %v775_v23 }
  0xb5   : > { %v343_v24 = vpop.permute.xlu0 %342 }
  0xbd   : > { %v348_v36 = vpop.permute.xlu0 %347 }
  0xd8   : > { %v471_v28 = vpop.f32.mrf.mxu0  ;;  %v485_v29 = vpop.f32.mrf.mxu1 }
  0xd9   : > { %v472_v30 = vadd.f32 %v471_v28, %v343_v24  ;;  %v486_v31 = vadd.f32 %v485_v29, %v343_v24 }
  0xdb   : > { %v530_v32 = vadd.f32 %v522_v26, %v472_v30  ;;  %v531_v33 = vadd.f32 %v523_v27, %v486_v31 }
  0xdd   : > { %538 = vst [vmem:[%s1116_s8] sm:$0xff] %v530_v32  ;;  %v499_v39 = vpop.f32.mrf.mxu2 }
  0xde   : > { %539 = vst [vmem:[%s1116_s8 + $0x8] sm:$0xff] %v531_v33  ;;  %v500_v43 = vadd.f32 %v499_v39, %v343_v24 }
  0xdf   : > { %v513_v40 = vpop.f32.mrf.mxu3 }
  0xe0   : > { %v514_v44 = vadd.f32 %v513_v40, %v343_v24  ;;  %v473_v45 = vpop.f32.mrf.mxu0  ;;  %v487_v46 = vpop.f32.mrf.mxu1  ;;  %v532_v49 = vadd.f32 %v524_v37, %v500_v43 }
  0xe1   : > { %v474_v47 = vadd.f32 %v473_v45, %v348_v36  ;;  %v488_v48 = vadd.f32 %v487_v46, %v348_v36 }
  0xe2   : > { %v533_v50 = vadd.f32 %v525_v38, %v514_v44  ;;  %540 = vst [vmem:[%s1116_s8 + $0x10] sm:$0xff] %v532_v49 }
  0xe3   : > { %v534_v51 = vadd.f32 %v526_v41, %v474_v47  ;;  %v535_v52 = vadd.f32 %v527_v42, %v488_v48 }
  0xe4   : > { %541 = vst [vmem:[%s1116_s8 + $0x18] sm:$0xff] %v533_v50  ;;  %v570_v62 = vld [vmem:[%s1116_s8] sm:$0xff] (%p987_p6) }
  0xe5   : > { %542 = vst [vmem:[%s1116_s8 + $0x20] sm:$0xff] %v534_v51  ;;  %v501_v56 = vpop.f32.mrf.mxu2  ;;  %v572_v63 = vld [vmem:[%s1116_s8 + $0x8] sm:$0xff] (%p987_p6) }
  0xe6   : > { %543 = vst [vmem:[%s1116_s8 + $0x28] sm:$0xff] %v535_v52  ;;  %v502_v58 = vadd.f32 %v501_v56, %v348_v36 }
  0xe7   : > { %v515_v57 = vpop.f32.mrf.mxu3  ;;  %571 = vst [vmem:[%s557_s27] sm:$0xff] (%p987_p6), %v570_v62 }
  0xe8   : > { %v516_v59 = vadd.f32 %v515_v57, %v348_v36  ;;  %v536_v60 = vadd.f32 %v528_v54, %v502_v58  ;;  %552 = sbr.rel (!%p987_p6) target bundleno = 245 (0xf5), region = 86  ;;  %573 = vst [vmem:[%s557_s27 + $0x8] sm:$0xff] (%p987_p6), %v572_v63 }
  0xe9   : > { %v574_v0 = vld [vmem:[%s1116_s8 + $0x10] sm:$0xff] (%p987_p6) }
  0xea   : > { %v537_v61 = vadd.f32 %v529_v55, %v516_v59  ;;  %544 = vst [vmem:[%s1116_s8 + $0x30] sm:$0xff] %v536_v60 }
  0xeb   : > { %v576_v1 = vld [vmem:[%s1116_s8 + $0x18] sm:$0xff] (%p987_p6)  ;;  %575 = vst [vmem:[%s557_s27 + $0x10] sm:$0xff] (%p987_p6), %v574_v0 }
  0xec   : > { %545 = vst [vmem:[%s1116_s8 + $0x38] sm:$0xff] %v537_v61  ;;  %v578_v2 = vld [vmem:[%s1116_s8 + $0x20] sm:$0xff] (%p987_p6) }
  0xed   : > { %v580_v3 = vld [vmem:[%s1116_s8 + $0x28] sm:$0xff]  ;;  %577 = vst [vmem:[%s557_s27 + $0x18] sm:$0xff] %v576_v1 }
  0xee   : > { %579 = vst [vmem:[%s557_s27 + $0x40] sm:$0xff] %v578_v2 }
  0xef   : > { %581 = vst [vmem:[%s557_s27 + $0x48] sm:$0xff] %v580_v3 }
  0xf1   : > { %v582_v4 = vld [vmem:[%s1116_s8 + $0x30] sm:$0xff] }
  0xf2   : > { %583 = vst [vmem:[%s557_s27 + $0x50] sm:$0xff] %v582_v4 }
  0xf3   : > { %v584_v5 = vld [vmem:[%s1116_s8 + $0x38] sm:$0xff] }
  0xf4   : > { %585 = vst [vmem:[%s557_s27 + $0x58] sm:$0xff] %v584_v5 }
  0xf5 PF: > { %s14_s21 = sadd.s32 1, %s907_s21   ;;  %s1170_s15 = smov %s887_s16 }
  0xf6   : > { %p11_p12 = scmp.ge.s32.totalorder %s14_s21, 6   ;;  %s1171_s16 = smov %s995_s5 }
  0xf7   : > { %s1172_s17 = smov %s899_s19  ;;  %s1173_s18 = smov %s903_s20 }
  0xf8   : > { %s1174_s19 = smov %s1177_s22  ;;  %s1175_s20 = smov %s1181_s23 }
  0xf9   :  { %13 = sbr.rel (!%p11_p12) target bundleno = 4 (0x4), region = 148 }

</bundles_post_ra>
